<compile_context>
chip_gen: v6e
topology: v6e:2x2x1
jax: 0.10.0
libtpu: 0.0.40
codegen_flags: <defaults>
</compile_context>

<pallas_src>
import functools

import jax
import jax.numpy as jnp
from jax import lax
from jax.experimental import pallas as pl
from jax.experimental.pallas import tpu as pltpu


def _round_up(v, m):
    return ((v + m - 1) // m) * m


def _decoder_kernel(enc_ref, embx_ref, amask_ref, w0_ref, h0_ref,
                    wi_ref, wh_ref, brz_ref, bn_i_ref, bn_h_ref,
                    wcls_ref, bcls_ref,
                    gate_ref, point_ref,
                    w_sc, h_sc, *, compute_dtype):
    """One grid step = one (batch block, decode step k) of the pointer recurrence."""
    k = pl.program_id(1)
    NS, Hp = w_sc.shape                       # padded slot rows, padded hidden
    S = enc_ref.shape[1]                      # lane-padded sequence length
    Hp2 = 2 * Hp
    cdt = compute_dtype

    # Recurrent state lives in VMEM scratch; (re)initialize at the first decode step
    # of every batch block.  nn.Dropout is identity at inference time.
    @pl.when(k == 0)
    def _init():
        w_sc[...] = w0_ref[...]
        h_sc[...] = h0_ref[...]

    enc = enc_ref[...]                        # (1, S, Hp)  compute dtype
    w = w_sc[...]                             # (NS, Hp) f32  current GRU input
    h = h_sc[...]                             # (NS, Hp) f32  current GRU hidden

    # ---- fused GRU step (PyTorch gate order r, z, n); gate blocks lane-aligned ----
    gi = jnp.dot(w.astype(cdt), wi_ref[...], preferred_element_type=jnp.float32)
    gh = jnp.dot(h.astype(cdt), wh_ref[...], preferred_element_type=jnp.float32)
    rz = jax.nn.sigmoid(gi[:, :Hp2] + gh[:, :Hp2] + brz_ref[...])   # pre-summed bias
    r = rz[:, :Hp]
    z = rz[:, Hp:]
    n = jnp.tanh(gi[:, Hp2:] + bn_i_ref[...] + r * (gh[:, Hp2:] + bn_h_ref[...]))
    h = (1.0 - z) * n + z * h                 # (NS, Hp) f32
    h_sc[...] = h

    # ---- attention scores over encoder outputs (batched MXU matmul) ----
    h3 = h.reshape(1, NS, Hp)
    scores = lax.dot_general(h3.astype(cdt), enc,
                             (((2,), (2,)), ((0,), (0,))),
                             preferred_element_type=jnp.float32)     # (1, NS, S)
    scores = scores + amask_ref[...]          # mask pre-broadcast to (1, NS, S)
    row_max = jnp.max(scores, axis=-1, keepdims=True)

    # ---- greedy pointer straight from the masked scores (argmax invariant under
    #      softmax); keeps exp/sum/reciprocal off the recurrence critical path ----
    seq_iota = lax.broadcasted_iota(jnp.int32, (1, NS, S), 2)
    idx = jnp.min(jnp.where(scores == row_max, seq_iota, jnp.int32(S)),
                  axis=-1, keepdims=True)                            # first max (ties)
    onehot = (seq_iota == idx).astype(cdt)                           # (1, NS, S)
    w_next = lax.dot_general(onehot, embx_ref[...],
                             (((2,), (1,)), ((0,), (0,))),
                             preferred_element_type=jnp.float32)     # (1, NS, Hp)
    w_sc[...] = w_next.reshape(NS, Hp)

    # ---- softmax probabilities (pointer output / gate context) ----
    e = jnp.exp(scores - row_max)
    inv = pl.reciprocal(jnp.sum(e, axis=-1, keepdims=True), approx=True)
    attn = e * inv                                                   # (1, NS, S) f32

    @pl.when(k == 0)
    def _gate():
        context = lax.dot_general(attn.astype(cdt), enc,
                                  (((2,), (1,)), ((0,), (0,))),
                                  preferred_element_type=jnp.float32)   # (1, NS, Hp)
        gate = jnp.dot(context.reshape(NS, Hp).astype(cdt), wcls_ref[...],
                       preferred_element_type=jnp.float32) + bcls_ref[...]
        gate_ref[...] = gate.reshape(1, NS, -1)

    # lane-dense streaming store; written back while step k+1 computes
    point_ref[...] = (attn + jnp.float32(1e-12)).astype(point_ref.dtype)

    # TODO(synk): teacher-forcing branch (teacher tensor) not implemented; this kernel
    # covers the teacher=None (greedy pointer) path only.


def decoder_forward(x, encoder_output, encoder_hidden, max_len, params,
                    compute_dtype=jnp.float32, point_dtype=jnp.float32):
    B, S = x.shape
    H = encoder_output.shape[-1]
    n_slots = params['slot_emb'].shape[0]
    n_op = params['wcls'].shape[-1]
    cdt = compute_dtype

    # ---- alignment padding: 128 lanes for S / H / n_op, 8 sublanes for slots ----
    S_pad = _round_up(S, 128)
    H_pad = _round_up(H, 128)
    NS_pad = _round_up(n_slots, 8)
    OP_pad = _round_up(n_op, 128)
    dh = H_pad - H

    # sequence padding + additive mask (pre-broadcast over slots -> no in-loop bcast)
    x_p = jnp.pad(x, ((0, 0), (0, S_pad - S)))                        # pad_idx == 0
    enc_p = jnp.pad(encoder_output, ((0, 0), (0, S_pad - S), (0, dh)))
    amask = jnp.where(x_p == 0, jnp.float32(-1e9), jnp.float32(0.0))
    amask = jnp.broadcast_to(amask[:, None, :], (B, NS_pad, S_pad))
    emb_x = jnp.take(params['embedding'], x_p, axis=0)                # (B, S_pad, H)
    emb_x = jnp.pad(emb_x, ((0, 0), (0, 0), (0, dh)))

    # fused GRU weights; each gate block zero-padded to a 128-lane boundary
    def pw(m):
        return jnp.pad(m, ((0, dh), (0, dh)))

    def pb(v):
        return jnp.pad(v, ((0, 0), (0, dh)))

    wi = jnp.concatenate([pw(params['wir']), pw(params['wiz']), pw(params['win'])], 1)
    wh = jnp.concatenate([pw(params['whr']), pw(params['whz']), pw(params['whn'])], 1)
    brz = jnp.concatenate([pb(params['bir'] + params['bhr']),
                           pb(params['biz'] + params['bhz'])], 1)     # pre-summed r/z bias
    bn_i = pb(params['bin'])
    bn_h = pb(params['bhn'])
    wcls = jnp.pad(params['wcls'], ((0, dh), (0, OP_pad - n_op)))
    bcls = jnp.pad(params['bcls'], ((0, 0), (0, OP_pad - n_op)))

    # initial GRU input (slot embeddings) / hidden state, slot axis padded to 8 rows
    slot0 = jnp.pad(params['slot_emb'], ((0, NS_pad - n_slots), (0, dh)))
    w0 = jnp.broadcast_to(slot0[None], (B, NS_pad, H_pad)).reshape(B * NS_pad, H_pad)
    h0 = jnp.pad(encoder_hidden.reshape(B, H), ((0, 0), (0, dh)))
    h0 = jnp.broadcast_to(h0[:, None, :], (B, NS_pad, H_pad)).reshape(B * NS_pad, H_pad)

    # ---- size-derived VMEM budget (instead of a fixed limit) ----
    cb = jnp.dtype(cdt).itemsize
    pbt = jnp.dtype(point_dtype).itemsize
    est = (2 * S_pad * H_pad * cb                 # enc + emb_x blocks
           + NS_pad * S_pad * 4                   # additive mask block
           + 2 * NS_pad * H_pad * 4               # w0 / h0 blocks
           + 2 * H_pad * 3 * H_pad * cb           # fused GRU weights
           + 4 * H_pad * 4                        # biases
           + H_pad * OP_pad * cb + OP_pad * 4     # classifier
           + NS_pad * OP_pad * 4                  # gate block
           + NS_pad * S_pad * pbt                 # point block (streamed per step)
           + 2 * NS_pad * H_pad * 4)              # recurrent state scratch
    vmem_limit = int(min(max(2 * est + (8 << 20), 24 << 20), 120 << 20))

    kernel = functools.partial(_decoder_kernel, compute_dtype=cdt)

    gate, point = pl.pallas_call(
        kernel,
        grid=(B, max_len),
        in_specs=[
            pl.BlockSpec((1, S_pad, H_pad), lambda b, k: (b, 0, 0)),   # enc
            pl.BlockSpec((1, S_pad, H_pad), lambda b, k: (b, 0, 0)),   # emb_x
            pl.BlockSpec((1, NS_pad, S_pad), lambda b, k: (b, 0, 0)),  # amask
            pl.BlockSpec((NS_pad, H_pad), lambda b, k: (b, 0)),        # w0
            pl.BlockSpec((NS_pad, H_pad), lambda b, k: (b, 0)),        # h0
            pl.BlockSpec((H_pad, 3 * H_pad), lambda b, k: (0, 0)),     # wi fused
            pl.BlockSpec((H_pad, 3 * H_pad), lambda b, k: (0, 0)),     # wh fused
            pl.BlockSpec((1, 2 * H_pad), lambda b, k: (0, 0)),         # brz bias
            pl.BlockSpec((1, H_pad), lambda b, k: (0, 0)),             # bn_i
            pl.BlockSpec((1, H_pad), lambda b, k: (0, 0)),             # bn_h
            pl.BlockSpec((H_pad, OP_pad), lambda b, k: (0, 0)),        # wcls
            pl.BlockSpec((1, OP_pad), lambda b, k: (0, 0)),            # bcls
        ],
        out_specs=[
            pl.BlockSpec((1, NS_pad, OP_pad), lambda b, k: (b, 0, 0)),   # gate (resident over k)
            pl.BlockSpec((1, NS_pad, S_pad), lambda b, k: (b, 0, k)),    # point (streamed per k)
        ],
        out_shape=[
            jax.ShapeDtypeStruct((B, NS_pad, OP_pad), jnp.float32),
            jax.ShapeDtypeStruct((B, NS_pad, max_len * S_pad), point_dtype),
        ],
        scratch_shapes=[pltpu.VMEM((NS_pad, H_pad), jnp.float32),    # w state
                        pltpu.VMEM((NS_pad, H_pad), jnp.float32)],   # h state
        compiler_params=pltpu.CompilerParams(
            dimension_semantics=("parallel", "arbitrary"),
            vmem_limit_bytes=vmem_limit),
    )(enc_p.astype(cdt), emb_x.astype(cdt), amask,
      w0.astype(jnp.float32), h0.astype(jnp.float32),
      wi.astype(cdt), wh.astype(cdt), brz, bn_i, bn_h,
      wcls.astype(cdt), bcls)

    gate = gate[:, :n_slots, :n_op]
    # free reshape: split the streamed last axis back into (max_len, S_pad), then
    # drop slot / sequence padding.  Already in (B, n_slots, max_len, S) layout.
    point = point.reshape(B, NS_pad, max_len, S_pad)[:, :n_slots, :, :S]
    return gate, point


def build_params(key, vocab_size, hidden_size, n_op, n_slots):
    ks = jax.random.split(key, 16)
    s = 1.0 / float(hidden_size) ** 0.5

    def u(k, shape):
        return jax.random.uniform(k, shape, jnp.float32, -s, s)

    return dict(
        embedding=jax.random.normal(ks[0], (vocab_size, hidden_size), jnp.float32),
        slot_emb=0.1 * jax.random.normal(ks[1], (n_slots, hidden_size), jnp.float32),
        wir=u(ks[2], (hidden_size, hidden_size)),
        wiz=u(ks[3], (hidden_size, hidden_size)),
        win=u(ks[4], (hidden_size, hidden_size)),
        whr=u(ks[5], (hidden_size, hidden_size)),
        whz=u(ks[6], (hidden_size, hidden_size)),
        whn=u(ks[7], (hidden_size, hidden_size)),
        bir=u(ks[8], (1, hidden_size)),
        biz=u(ks[9], (1, hidden_size)),
        bin=u(ks[10], (1, hidden_size)),
        bhr=u(ks[11], (1, hidden_size)),
        bhz=u(ks[12], (1, hidden_size)),
        bhn=u(ks[13], (1, hidden_size)),
        wcls=u(ks[14], (hidden_size, n_op)),
        bcls=u(ks[15], (1, n_op)),
    )


def decoder_ref(x, enc, encoder_hidden, max_len, p):
    """Pure-JAX f32 reference mirroring the PyTorch forward (teacher=None)."""
    B, S = x.shape
    H = enc.shape[-1]
    n_slots = p['slot_emb'].shape[0]
    h0 = encoder_hidden.reshape(B, H)
    mask = (x == 0)
    gates, points = [], []
    for j in range(n_slots):
        w = jnp.broadcast_to(p['slot_emb'][j:j + 1], (B, H))
        h = h0
        gate_j = None
        slot_points = []
        for k in range(max_len):
            r = jax.nn.sigmoid(w @ p['wir'] + p['bir'] + h @ p['whr'] + p['bhr'])
            z = jax.nn.sigmoid(w @ p['wiz'] + p['biz'] + h @ p['whz'] + p['bhz'])
            n = jnp.tanh(w @ p['win'] + p['bin'] + r * (h @ p['whn'] + p['bhn']))
            h = (1.0 - z) * n + z * h
            attn_e = jnp.einsum('bsh,bh->bs', enc, h)
            attn_e = jnp.where(mask, -1e9, attn_e)
            attn = jax.nn.softmax(attn_e, axis=-1)
            context = jnp.einsum('bs,bsh->bh', attn, enc)
            if k == 0:
                gate_j = context @ p['wcls'] + p['bcls']
            p_final = attn + 1e-12
            slot_points.append(p_final)
            w_idx = jnp.argmax(p_final, axis=-1)
            tok = jnp.take_along_axis(x, w_idx[:, None], axis=1)[:, 0]
            w = p['embedding'][tok]
        gates.append(gate_j)
        points.append(jnp.stack(slot_points, axis=1))
    return jnp.stack(gates, axis=1), jnp.stack(points, axis=1)


if __name__ == "__main__":
    B, S, H, V, n_op, n_slots, max_len = 2, 16, 32, 30, 4, 3, 4
    key = jax.random.PRNGKey(0)
    k_x, k_enc, k_h, k_p = jax.random.split(key, 4)

    x = jax.random.randint(k_x, (B, S), 1, V, dtype=jnp.int32)
    x = x.at[:, -3:].set(0)                 # trailing pad tokens (pad_idx = 0)
    encoder_output = jax.random.normal(k_enc, (B, S, H), jnp.float32)
    encoder_hidden = jax.random.normal(k_h, (1, B, H), jnp.float32)
    params = build_params(k_p, V, H, n_op, n_slots)

    # --- f32 compute path: check against the pure-JAX reference ---
    gate, point = decoder_forward(x, encoder_output, encoder_hidden, max_len, params,
                                  compute_dtype=jnp.float32, point_dtype=jnp.float32)
    jax.block_until_ready((gate, point))
    gate_r, point_r = decoder_ref(x, encoder_output, encoder_hidden, max_len, params)

    assert gate.shape == (B, n_slots, n_op)
    assert point.shape == (B, n_slots, max_len, S)
    # tolerance leaves headroom for the approximate (EUP) softmax reciprocal
    assert jnp.allclose(gate, gate_r, atol=1e-2, rtol=1e-2), \
        float(jnp.max(jnp.abs(gate - gate_r)))
    assert jnp.allclose(point, point_r, atol=1e-2, rtol=1e-2), \
        float(jnp.max(jnp.abs(point - point_r)))

    # --- bf16 compute path (heavy operands + point output in bf16, f32 state) ---
    # Only shape/finiteness checked: the greedy-argmax recurrence may legally pick a
    # different token on numerically near-tied pointer maxima under bf16 rounding.
    gate_b, point_b = decoder_forward(x, encoder_output, encoder_hidden, max_len, params,
                                      compute_dtype=jnp.bfloat16,
                                      point_dtype=jnp.bfloat16)
    jax.block_until_ready((gate_b, point_b))
    assert gate_b.shape == (B, n_slots, n_op)
    assert point_b.shape == (B, n_slots, max_len, S)
    assert bool(jnp.isfinite(gate_b).all())
    assert bool(jnp.isfinite(point_b.astype(jnp.float32)).all())

    print("KERNEL_OK")
</pallas_src>

<mosaic_0001>
module attributes {stable_mosaic.version = 11 : i64} {
  func.func @_decoder_kernel(%arg0: i32, %arg1: i32, %arg2: memref<1x128x128xf32, #tpu.memory_space<vmem>>, %arg3: memref<1x128x128xf32, #tpu.memory_space<vmem>>, %arg4: memref<1x8x128xf32, #tpu.memory_space<vmem>>, %arg5: memref<8x128xf32, #tpu.memory_space<vmem>>, %arg6: memref<8x128xf32, #tpu.memory_space<vmem>>, %arg7: memref<128x384xf32, #tpu.memory_space<vmem>>, %arg8: memref<128x384xf32, #tpu.memory_space<vmem>>, %arg9: memref<1x256xf32, #tpu.memory_space<vmem>>, %arg10: memref<1x128xf32, #tpu.memory_space<vmem>>, %arg11: memref<1x128xf32, #tpu.memory_space<vmem>>, %arg12: memref<128x128xf32, #tpu.memory_space<vmem>>, %arg13: memref<1x128xf32, #tpu.memory_space<vmem>>, %arg14: memref<1x8x128xf32, #tpu.memory_space<vmem>>, %arg15: memref<1x8x128xf32, #tpu.memory_space<vmem>>, %arg16: memref<8x128xf32, #tpu.memory_space<vmem>>, %arg17: memref<8x128xf32, #tpu.memory_space<vmem>>) attributes {dimension_semantics = [#tpu.dimension_semantics<parallel>, #tpu.dimension_semantics<arbitrary>], iteration_bounds = array<i64: 2, 4>, scalar_prefetch = 0 : i64, scratch_operands = 2 : i64, tpu.core_type = #tpu.core_type<tc>, window_params = [{transform_indices = @transform_0, window_bounds = array<i64: 1, 128, 128>}, {transform_indices = @transform_1, window_bounds = array<i64: 1, 128, 128>}, {transform_indices = @transform_2, window_bounds = array<i64: 1, 8, 128>}, {transform_indices = @transform_3, window_bounds = array<i64: 8, 128>}, {transform_indices = @transform_4, window_bounds = array<i64: 8, 128>}, {pipeline_mode = #tpu.pipeline_mode<synchronous>, transform_indices = @transform_5, window_bounds = array<i64: 128, 384>}, {pipeline_mode = #tpu.pipeline_mode<synchronous>, transform_indices = @transform_6, window_bounds = array<i64: 128, 384>}, {pipeline_mode = #tpu.pipeline_mode<synchronous>, transform_indices = @transform_7, window_bounds = array<i64: 1, 256>}, {pipeline_mode = #tpu.pipeline_mode<synchronous>, transform_indices = @transform_8, window_bounds = array<i64: 1, 128>}, {pipeline_mode = #tpu.pipeline_mode<synchronous>, transform_indices = @transform_9, window_bounds = array<i64: 1, 128>}, {pipeline_mode = #tpu.pipeline_mode<synchronous>, transform_indices = @transform_10, window_bounds = array<i64: 128, 128>}, {pipeline_mode = #tpu.pipeline_mode<synchronous>, transform_indices = @transform_11, window_bounds = array<i64: 1, 128>}, {transform_indices = @transform_12, window_bounds = array<i64: 1, 8, 128>}, {transform_indices = @transform_13, window_bounds = array<i64: 1, 8, 128>}]} {
    %c0_i32 = arith.constant 0 : i32
    %0 = arith.cmpi eq, %arg1, %c0_i32 : i32
    %1 = arith.extui %0 : i1 to i32
    %c0_i32_0 = arith.constant 0 : i32
    %2 = arith.cmpi ne, %1, %c0_i32_0 : i32
    scf.if %2 {
      %c0_41 = arith.constant 0 : index
      %c0_42 = arith.constant 0 : index
      %75 = vector.load %arg5[%c0_41, %c0_42] : memref<8x128xf32, #tpu.memory_space<vmem>>, vector<8x128xf32>
      %c0_43 = arith.constant 0 : index
      %c0_44 = arith.constant 0 : index
      %76 = vector.load %arg16[%c0_43, %c0_44] : memref<8x128xf32, #tpu.memory_space<vmem>>, vector<8x128xf32>
      tpu.vector_store %arg16[%c0_43, %c0_44], %75 {strides = array<i32>} : memref<8x128xf32, #tpu.memory_space<vmem>>, vector<8x128xf32>,
      %c0_45 = arith.constant 0 : index
      %c0_46 = arith.constant 0 : index
      %77 = vector.load %arg6[%c0_45, %c0_46] : memref<8x128xf32, #tpu.memory_space<vmem>>, vector<8x128xf32>
      %c0_47 = arith.constant 0 : index
      %c0_48 = arith.constant 0 : index
      %78 = vector.load %arg17[%c0_47, %c0_48] : memref<8x128xf32, #tpu.memory_space<vmem>>, vector<8x128xf32>
      tpu.vector_store %arg17[%c0_47, %c0_48], %77 {strides = array<i32>} : memref<8x128xf32, #tpu.memory_space<vmem>>, vector<8x128xf32>,
    } else {
    }
    %c0 = arith.constant 0 : index
    %c0_1 = arith.constant 0 : index
    %c0_2 = arith.constant 0 : index
    %3 = vector.load %arg2[%c0, %c0_1, %c0_2] : memref<1x128x128xf32, #tpu.memory_space<vmem>>, vector<1x128x128xf32>
    %c0_3 = arith.constant 0 : index
    %c0_4 = arith.constant 0 : index
    %4 = vector.load %arg16[%c0_3, %c0_4] : memref<8x128xf32, #tpu.memory_space<vmem>>, vector<8x128xf32>
    %c0_5 = arith.constant 0 : index
    %c0_6 = arith.constant 0 : index
    %5 = vector.load %arg17[%c0_5, %c0_6] : memref<8x128xf32, #tpu.memory_space<vmem>>, vector<8x128xf32>
    %c0_7 = arith.constant 0 : index
    %c0_8 = arith.constant 0 : index
    %6 = vector.load %arg7[%c0_7, %c0_8] : memref<128x384xf32, #tpu.memory_space<vmem>>, vector<128x384xf32>
    %cst = arith.constant dense<0.000000e+00> : vector<8x384xf32>
    %7 = tpu.matmul %4, %6, %cst {dimension_numbers = #tpu.dot_dimension_numbers<[1], [0], [0], [1], [0, 0, 1, 1], [], []>} : vector<8x128xf32>, vector<128x384xf32>, vector<8x384xf32> -> vector<8x384xf32>
    %c0_9 = arith.constant 0 : index
    %c0_10 = arith.constant 0 : index
    %8 = vector.load %arg8[%c0_9, %c0_10] : memref<128x384xf32, #tpu.memory_space<vmem>>, vector<128x384xf32>
    %cst_11 = arith.constant dense<0.000000e+00> : vector<8x384xf32>
    %9 = tpu.matmul %5, %8, %cst_11 {dimension_numbers = #tpu.dot_dimension_numbers<[1], [0], [0], [1], [0, 0, 1, 1], [], []>} : vector<8x128xf32>, vector<128x384xf32>, vector<8x384xf32> -> vector<8x384xf32>
    %10 = vector.extract_strided_slice %7 {offsets = [0, 0], sizes = [8, 256], strides = [1, 1]} : vector<8x384xf32> to vector<8x256xf32>
    %11 = vector.extract_strided_slice %9 {offsets = [0, 0], sizes = [8, 256], strides = [1, 1]} : vector<8x384xf32> to vector<8x256xf32>
    %12 = arith.addf %10, %11 : vector<8x256xf32>
    %c0_12 = arith.constant 0 : index
    %c0_13 = arith.constant 0 : index
    %13 = vector.load %arg9[%c0_12, %c0_13] : memref<1x256xf32, #tpu.memory_space<vmem>>, vector<1x256xf32>
    %14 = vector.broadcast %13 : vector<1x256xf32> to vector<8x256xf32>
    %15 = arith.addf %12, %14 : vector<8x256xf32>
    %16 = arith.negf %15 : vector<8x256xf32>
    %17 = math.exp %16 : vector<8x256xf32>
    %cst_14 = arith.constant 1.000000e+00 : f32
    %18 = vector.broadcast %cst_14 : f32 to vector<8x256xf32>
    %19 = arith.addf %18, %17 : vector<8x256xf32>
    %20 = arith.divf %18, %19 : vector<8x256xf32>
    %21 = vector.extract_strided_slice %20 {offsets = [0, 0], sizes = [8, 128], strides = [1, 1]} : vector<8x256xf32> to vector<8x128xf32>
    %22 = vector.extract_strided_slice %20 {offsets = [0, 128], sizes = [8, 128], strides = [1, 1]} : vector<8x256xf32> to vector<8x128xf32>
    %23 = vector.extract_strided_slice %7 {offsets = [0, 256], sizes = [8, 128], strides = [1, 1]} : vector<8x384xf32> to vector<8x128xf32>
    %c0_15 = arith.constant 0 : index
    %c0_16 = arith.constant 0 : index
    %24 = vector.load %arg10[%c0_15, %c0_16] : memref<1x128xf32, #tpu.memory_space<vmem>>, vector<1x128xf32>
    %25 = vector.broadcast %24 : vector<1x128xf32> to vector<8x128xf32>
    %26 = arith.addf %23, %25 : vector<8x128xf32>
    %27 = vector.extract_strided_slice %9 {offsets = [0, 256], sizes = [8, 128], strides = [1, 1]} : vector<8x384xf32> to vector<8x128xf32>
    %c0_17 = arith.constant 0 : index
    %c0_18 = arith.constant 0 : index
    %28 = vector.load %arg11[%c0_17, %c0_18] : memref<1x128xf32, #tpu.memory_space<vmem>>, vector<1x128xf32>
    %29 = vector.broadcast %28 : vector<1x128xf32> to vector<8x128xf32>
    %30 = arith.addf %27, %29 : vector<8x128xf32>
    %31 = arith.mulf %21, %30 : vector<8x128xf32>
    %32 = arith.addf %26, %31 : vector<8x128xf32>
    %33 = math.tanh %32 : vector<8x128xf32>
    %cst_19 = arith.constant 1.000000e+00 : f32
    %34 = vector.broadcast %cst_19 : f32 to vector<8x128xf32>
    %35 = arith.subf %34, %22 : vector<8x128xf32>
    %36 = arith.mulf %35, %33 : vector<8x128xf32>
    %37 = arith.mulf %22, %5 : vector<8x128xf32>
    %38 = arith.addf %36, %37 : vector<8x128xf32>
    %c0_20 = arith.constant 0 : index
    %c0_21 = arith.constant 0 : index
    %39 = vector.load %arg17[%c0_20, %c0_21] : memref<8x128xf32, #tpu.memory_space<vmem>>, vector<8x128xf32>
    tpu.vector_store %arg17[%c0_20, %c0_21], %38 {strides = array<i32>} : memref<8x128xf32, #tpu.memory_space<vmem>>, vector<8x128xf32>,
    %40 = vector.shape_cast %38 : vector<8x128xf32> to vector<1x8x128xf32>
    %cst_22 = arith.constant dense<0.000000e+00> : vector<1x8x128xf32>
    %41 = tpu.matmul %40, %3, %cst_22 {dimension_numbers = #tpu.dot_dimension_numbers<[2], [2], [1], [1], [0, 0, 0, 1, 1, 1], [0], [0]>} : vector<1x8x128xf32>, vector<1x128x128xf32>, vector<1x8x128xf32> -> vector<1x8x128xf32>
    %c0_23 = arith.constant 0 : index
    %c0_24 = arith.constant 0 : index
    %c0_25 = arith.constant 0 : index
    %42 = vector.load %arg4[%c0_23, %c0_24, %c0_25] : memref<1x8x128xf32, #tpu.memory_space<vmem>>, vector<1x8x128xf32>
    %43 = arith.addf %41, %42 : vector<1x8x128xf32>
    %cst_26 = arith.constant dense<0xFF800000> : vector<1x8xf32>
    %44 = vector.multi_reduction <maximumf>, %43, %cst_26 [2] : vector<1x8x128xf32> to vector<1x8xf32>
    %45 = vector.shape_cast %44 : vector<1x8xf32> to vector<1x8x1xf32>
    %46 = tpu.iota {dimensions = array<i32: 2>} : vector<1x8x128xi32>
    %47 = vector.broadcast %45 : vector<1x8x1xf32> to vector<1x8x128xf32>
    %48 = arith.cmpf oeq, %43, %47 : vector<1x8x128xf32>
    %c128_i32 = arith.constant 128 : i32
    %49 = vector.broadcast %c128_i32 : i32 to vector<1x8x128xi32>
    %50 = arith.select %48, %46, %49 : vector<1x8x128xi1>, vector<1x8x128xi32>
    %cst_27 = arith.constant dense<2147483647> : vector<1x8xi32>
    %51 = vector.multi_reduction <minsi>, %50, %cst_27 [2] : vector<1x8x128xi32> to vector<1x8xi32>
    %52 = vector.shape_cast %51 : vector<1x8xi32> to vector<1x8x1xi32>
    %53 = vector.broadcast %52 : vector<1x8x1xi32> to vector<1x8x128xi32>
    %54 = arith.cmpi eq, %46, %53 : vector<1x8x128xi32>
    %55 = arith.extui %54 : vector<1x8x128xi1> to vector<1x8x128xi32>
    %56 = arith.sitofp %55 : vector<1x8x128xi32> to vector<1x8x128xf32>
    %c0_28 = arith.constant 0 : index
    %c0_29 = arith.constant 0 : index
    %c0_30 = arith.constant 0 : index
    %57 = vector.load %arg3[%c0_28, %c0_29, %c0_30] : memref<1x128x128xf32, #tpu.memory_space<vmem>>, vector<1x128x128xf32>
    %cst_31 = arith.constant dense<0.000000e+00> : vector<1x8x128xf32>
    %58 = tpu.matmul %56, %57, %cst_31 {dimension_numbers = #tpu.dot_dimension_numbers<[2], [1], [1], [2], [0, 0, 0, 1, 1, 2], [0], [0]>} : vector<1x8x128xf32>, vector<1x128x128xf32>, vector<1x8x128xf32> -> vector<1x8x128xf32>
    %59 = vector.shape_cast %58 : vector<1x8x128xf32> to vector<8x128xf32>
    %c0_32 = arith.constant 0 : index
    %c0_33 = arith.constant 0 : index
    %60 = vector.load %arg16[%c0_32, %c0_33] : memref<8x128xf32, #tpu.memory_space<vmem>>, vector<8x128xf32>
    tpu.vector_store %arg16[%c0_32, %c0_33], %59 {strides = array<i32>} : memref<8x128xf32, #tpu.memory_space<vmem>>, vector<8x128xf32>,
    %61 = vector.broadcast %45 : vector<1x8x1xf32> to vector<1x8x128xf32>
    %62 = arith.subf %43, %61 : vector<1x8x128xf32>
    %63 = math.exp %62 : vector<1x8x128xf32>
    %cst_34 = arith.constant dense<0.000000e+00> : vector<1x8xf32>
    %64 = vector.multi_reduction <add>, %63, %cst_34 [2] : vector<1x8x128xf32> to vector<1x8xf32>
    %65 = vector.shape_cast %64 : vector<1x8xf32> to vector<1x8x1xf32>
    %66 = tpu.reciprocal %65 {approx = true} : vector<1x8x1xf32> -> vector<1x8x1xf32>
    %67 = vector.broadcast %66 : vector<1x8x1xf32> to vector<1x8x128xf32>
    %68 = arith.mulf %63, %67 : vector<1x8x128xf32>
    %c0_i32_35 = arith.constant 0 : i32
    %69 = arith.cmpi eq, %arg1, %c0_i32_35 : i32
    %70 = arith.extui %69 : i1 to i32
    %c0_i32_36 = arith.constant 0 : i32
    %71 = arith.cmpi ne, %70, %c0_i32_36 : i32
    scf.if %71 {
      %cst_41 = arith.constant dense<0.000000e+00> : vector<1x8x128xf32>
      %75 = tpu.matmul %68, %3, %cst_41 {dimension_numbers = #tpu.dot_dimension_numbers<[2], [1], [1], [2], [0, 0, 0, 1, 1, 2], [0], [0]>} : vector<1x8x128xf32>, vector<1x128x128xf32>, vector<1x8x128xf32> -> vector<1x8x128xf32>
      %76 = vector.shape_cast %75 : vector<1x8x128xf32> to vector<8x128xf32>
      %c0_42 = arith.constant 0 : index
      %c0_43 = arith.constant 0 : index
      %77 = vector.load %arg12[%c0_42, %c0_43] : memref<128x128xf32, #tpu.memory_space<vmem>>, vector<128x128xf32>
      %cst_44 = arith.constant dense<0.000000e+00> : vector<8x128xf32>
      %78 = tpu.matmul %76, %77, %cst_44 {dimension_numbers = #tpu.dot_dimension_numbers<[1], [0], [0], [1], [0, 0, 1, 1], [], []>} : vector<8x128xf32>, vector<128x128xf32>, vector<8x128xf32> -> vector<8x128xf32>
      %c0_45 = arith.constant 0 : index
      %c0_46 = arith.constant 0 : index
      %79 = vector.load %arg13[%c0_45, %c0_46] : memref<1x128xf32, #tpu.memory_space<vmem>>, vector<1x128xf32>
      %80 = vector.broadcast %79 : vector<1x128xf32> to vector<8x128xf32>
      %81 = arith.addf %78, %80 : vector<8x128xf32>
      %82 = vector.shape_cast %81 : vector<8x128xf32> to vector<1x8x128xf32>
      %c0_47 = arith.constant 0 : index
      %c0_48 = arith.constant 0 : index
      %c0_49 = arith.constant 0 : index
      %83 = vector.load %arg14[%c0_47, %c0_48, %c0_49] : memref<1x8x128xf32, #tpu.memory_space<vmem>>, vector<1x8x128xf32>
      tpu.vector_store %arg14[%c0_47, %c0_48, %c0_49], %82 {strides = array<i32>} : memref<1x8x128xf32, #tpu.memory_space<vmem>>, vector<1x8x128xf32>,
    } else {
    }
    %cst_37 = arith.constant 9.99999996E-13 : f32
    %72 = vector.broadcast %cst_37 : f32 to vector<1x8x128xf32>
    %73 = arith.addf %68, %72 : vector<1x8x128xf32>
    %c0_38 = arith.constant 0 : index
    %c0_39 = arith.constant 0 : index
    %c0_40 = arith.constant 0 : index
    %74 = vector.load %arg15[%c0_38, %c0_39, %c0_40] : memref<1x8x128xf32, #tpu.memory_space<vmem>>, vector<1x8x128xf32>
    tpu.vector_store %arg15[%c0_38, %c0_39, %c0_40], %73 {strides = array<i32>} : memref<1x8x128xf32, #tpu.memory_space<vmem>>, vector<1x8x128xf32>,
    return
  }
  func.func @transform_0(%arg0: i32, %arg1: i32) -> (i32, i32, i32) {
    %c0_i32 = arith.constant 0 : i32
    %c0_i32_0 = arith.constant 0 : i32
    %c0_i32_1 = arith.constant 0 : i32
    return %arg0, %c0_i32, %c0_i32_0 : i32, i32, i32
  }
  func.func @transform_1(%arg0: i32, %arg1: i32) -> (i32, i32, i32) {
    %c0_i32 = arith.constant 0 : i32
    %c0_i32_0 = arith.constant 0 : i32
    %c0_i32_1 = arith.constant 0 : i32
    return %arg0, %c0_i32, %c0_i32_0 : i32, i32, i32
  }
  func.func @transform_2(%arg0: i32, %arg1: i32) -> (i32, i32, i32) {
    %c0_i32 = arith.constant 0 : i32
    %c0_i32_0 = arith.constant 0 : i32
    %c0_i32_1 = arith.constant 0 : i32
    return %arg0, %c0_i32, %c0_i32_0 : i32, i32, i32
  }
  func.func @transform_3(%arg0: i32, %arg1: i32) -> (i32, i32) {
    %c0_i32 = arith.constant 0 : i32
    %c0_i32_0 = arith.constant 0 : i32
    return %arg0, %c0_i32 : i32, i32
  }
  func.func @transform_4(%arg0: i32, %arg1: i32) -> (i32, i32) {
    %c0_i32 = arith.constant 0 : i32
    %c0_i32_0 = arith.constant 0 : i32
    return %arg0, %c0_i32 : i32, i32
  }
  func.func @transform_5(%arg0: i32, %arg1: i32) -> (i32, i32) {
    %c0_i32 = arith.constant 0 : i32
    %c0_i32_0 = arith.constant 0 : i32
    %c0_i32_1 = arith.constant 0 : i32
    return %c0_i32, %c0_i32_0 : i32, i32
  }
  func.func @transform_6(%arg0: i32, %arg1: i32) -> (i32, i32) {
    %c0_i32 = arith.constant 0 : i32
    %c0_i32_0 = arith.constant 0 : i32
    %c0_i32_1 = arith.constant 0 : i32
    return %c0_i32, %c0_i32_0 : i32, i32
  }
  func.func @transform_7(%arg0: i32, %arg1: i32) -> (i32, i32) {
    %c0_i32 = arith.constant 0 : i32
    %c0_i32_0 = arith.constant 0 : i32
    %c0_i32_1 = arith.constant 0 : i32
    return %c0_i32, %c0_i32_0 : i32, i32
  }
  func.func @transform_8(%arg0: i32, %arg1: i32) -> (i32, i32) {
    %c0_i32 = arith.constant 0 : i32
    %c0_i32_0 = arith.constant 0 : i32
    %c0_i32_1 = arith.constant 0 : i32
    return %c0_i32, %c0_i32_0 : i32, i32
  }
  func.func @transform_9(%arg0: i32, %arg1: i32) -> (i32, i32) {
    %c0_i32 = arith.constant 0 : i32
    %c0_i32_0 = arith.constant 0 : i32
    %c0_i32_1 = arith.constant 0 : i32
    return %c0_i32, %c0_i32_0 : i32, i32
  }
  func.func @transform_10(%arg0: i32, %arg1: i32) -> (i32, i32) {
    %c0_i32 = arith.constant 0 : i32
    %c0_i32_0 = arith.constant 0 : i32
    %c0_i32_1 = arith.constant 0 : i32
    return %c0_i32, %c0_i32_0 : i32, i32
  }
  func.func @transform_11(%arg0: i32, %arg1: i32) -> (i32, i32) {
    %c0_i32 = arith.constant 0 : i32
    %c0_i32_0 = arith.constant 0 : i32
    %c0_i32_1 = arith.constant 0 : i32
    return %c0_i32, %c0_i32_0 : i32, i32
  }
  func.func @transform_12(%arg0: i32, %arg1: i32) -> (i32, i32, i32) {
    %c0_i32 = arith.constant 0 : i32
    %c0_i32_0 = arith.constant 0 : i32
    %c0_i32_1 = arith.constant 0 : i32
    return %arg0, %c0_i32, %c0_i32_0 : i32, i32, i32
  }
  func.func @transform_13(%arg0: i32, %arg1: i32) -> (i32, i32, i32) {
    %c0_i32 = arith.constant 0 : i32
    %c0_i32_0 = arith.constant 0 : i32
    return %arg0, %c0_i32, %arg1 : i32, i32, i32
  }
}

</mosaic_0001>

<bundles_post_ra>
// kernel: tpu_custom_call.1
= control target key start
LH: loop header
LB: loop body
LE: loop exit
PB: predicated region body
PF: predicated region fallthrough
CT: control target
= control target key end

     0   :  { %s3413_s0 = inlined_call_operand.hbm [shape: f32[2,128,128], index: 0, kind: input, shape index: {}]   ;;  %s3414_s1 = inlined_call_operand.hbm [shape: f32[2,128,128], index: 1, kind: input, shape index: {}]   ;;  %s3415_s2 = inlined_call_operand.hbm [shape: f32[2,8,128], index: 2, kind: input, shape index: {}]   ;;  %s3416_s3 = inlined_call_operand.hbm [shape: f32[16,128], index: 3, kind: input, shape index: {}]   ;;  %s3417_s4 = inlined_call_operand.hbm [shape: f32[16,128], index: 4, kind: input, shape index: {}]   ;;  %s3418_s5 = inlined_call_operand.hbm [shape: f32[128,384], index: 5, kind: input, shape index: {}]   ;;  %s3419_s6 = inlined_call_operand.hbm [shape: f32[128,384], index: 6, kind: input, shape index: {}]   ;;  %s3420_s7 = inlined_call_operand.vmem [shape: f32[1,256], index: 7, kind: input, shape index: {}]   ;;  %s3421_s8 = inlined_call_operand.vmem [shape: f32[1,128], index: 8, kind: input, shape index: {}]   ;;  %s3422_s9 = inlined_call_operand.vmem [shape: f32[1,128], index: 9, kind: input, shape index: {}]   ;;  %s3423_s10 = inlined_call_operand.hbm [shape: f32[128,128], index: 10, kind: input, shape index: {}]   ;;  %s3424_s11 = inlined_call_operand.vmem [shape: f32[1,128], index: 11, kind: input, shape index: {}]   ;;  %s3425_s12 = inlined_call_operand.hbm [shape: f32[2,8,128], index: 12, kind: output, shape index: {0}]   ;;  %s3426_s13 = inlined_call_operand.hbm [shape: f32[2,8,512], index: 13, kind: output, shape index: {1}]  }
   0x1   :  { %3460 = sst [smem:[#allocation47_spill]] %s3414_s1 }
   0x2   :  { %3461 = sst [smem:[#allocation48_spill]] %s3418_s5 }
   0x3   :  { %3462 = sst [smem:[#allocation49_spill]] %s3420_s7 }
   0x4   :  { %3463 = sst [smem:[#allocation50_spill]] %s3421_s8 }
   0x5   :  { %3464 = sst [smem:[#allocation51_spill]] %s3422_s9 }
   0x6   :  { %3465 = sst [smem:[#allocation52_spill]] %s3424_s11 }
   0x7   :  { %3466 = sst [smem:[#allocation53_spill]] %s3425_s12 }
   0x8   :  { %3467 = sst [smem:[#allocation54_spill]] %s3426_s13 }
   0x9   :  { %19 = vsyncpa [#allocation5], 0 }
   0xa   :  { %21 = vsyncpa [#allocation5 + $0x1], 0 }
   0xb   :  { %22 = vsyncpa [#allocation8], 0 }
   0xc   :  { %24 = vsyncpa [#allocation8 + $0x1], 0 }
   0xd   :  { %25 = vsyncpa [#allocation11], 0 }
   0xe   :  { %27 = vsyncpa [#allocation11 + $0x1], 0 }
   0xf   :  { %28 = vsyncpa [#allocation14], 0 }
  0x10   :  { %29 = vsyncpa [#allocation17], 0 }
  0x11   :  { %30 = vsyncpa [#allocation6], 0 }
  0x12   :  { %32 = vsyncpa [#allocation6 + $0x1], 0 }
  0x13   :  { %33 = vsyncpa [#allocation20], 0 }
  0x14   :  { %35 = vsyncpa [#allocation20 + $0x1], 0  ;;  %s2766_s25 = smov 0   ;;  %s2768_s26 = smov 0  }
  0x15   :  { %s2770_s27 = smov 0   ;;  %s2772_s28 = smov 0  }
  0x16   :  { %s2774_s29 = smov 0   ;;  %s2776_s30 = smov 0  }
  0x17   :  { %s2778_s14 = smov 0   ;;  %s2780_s15 = smov 0  }
  0x18   :  { %s2782_s16 = smov 0   ;;  %s2784_s17 = smov 0  }
  0x19   :  { %s2786_s18 = smov 0  }
  0x1a LB: > { %3468 = sst [smem:[#allocation28_spill]] %s2635_s25  ;;  %s2822_s19 = sadd.s32 4294967295, %s2675_s18   ;;  %s2675_s18 = sphi %s2786_s18, %s41_s18   ;;  %s2671_s17 = sphi %s2784_s17, %s3551_s17   ;;  %s2667_s16 = sphi %s2782_s16, %s3548_s16   ;;  %s2663_s15 = sphi %s2780_s15, %s3550_s15   ;;  %s2659_s14 = sphi %s2778_s14, %s3547_s14   ;;  %s2655_s30 = sphi %s2776_s30, %s3546_s30   ;;  %s2651_s29 = sphi %s2774_s29, %s3545_s29   ;;  %s2647_s28 = sphi %s2772_s28, %s3544_s28   ;;  %s2643_s27 = sphi %s2770_s27, %s3543_s27   ;;  %s2639_s26 = sphi %s2768_s26, %s3542_s26   ;;  %s2635_s25 = sphi %s2766_s25, %s3541_s25  }
  0x1b   : > { %3469 = sst [smem:[#allocation29_spill]] %s2639_s26  ;;  %s1751_s20 = sadd.s32 4294967294, %s2675_s18  }
  0x1c   : > { %3470 = sst [smem:[#allocation30_spill]] %s2643_s27  ;;  %p67_p0 = scmp.ne.s32.totalorder %s2655_s30, %s2651_s29 }
  0x1d   : > { %3471 = sst [smem:[#allocation31_spill]] %s2647_s28  ;;  %p68_p1 = scmp.eq.s32.totalorder %s2675_s18, 0 }
  0x1e   : > { %3472 = sst [smem:[#allocation32_spill]] %s2651_s29  ;;  %p73_p2 = scmp.ne.s32.totalorder %s2651_s29, %s2647_s28 }
  0x1f   : > { %3473 = sst [smem:[#allocation33_spill]] %s2655_s30  ;;  %p3428_p3 = scmp.eq.s32.totalorder %s2822_s19, 0 }
  0x20   : > { %3474 = sst [smem:[#allocation34_spill]] %s2659_s14  ;;  %p348_p4 = scmp.eq.s32.totalorder %s2822_s19, 7 }
  0x21   : > { %3475 = sst [smem:[#allocation35_spill]] %s2663_s15  ;;  %p2833_p5 = por %p68_p1, %p67_p0 }
  0x22   : > { %3476 = sst [smem:[#allocation36_spill]] %s2667_s16  ;;  %p354_p6 = scmp.eq.s32.totalorder %s1751_s20, 7 }
  0x23   : > { %3477 = sst [smem:[#allocation37_spill]] %s2822_s19  ;;  %p2839_p7 = por %p3428_p3, %p73_p2 }
  0x24   : > { %p2843_p8 = por %p348_p4, %p67_p0  ;;  %p2847_p9 = por %p354_p6, %p73_p2 }
  0x25   : > { %s3479_s23 = scalar_select %p2839_p7, 1, 0 }
  0x26   : > { %s3481_s24 = scalar_select %p2843_p8, 1, 0 }
  0x27   : > { %3480 = sst [smem:[#allocation38_spill]] %s3479_s23  ;;  %p375_p10 = scmp.ne.s32.totalorder %s2643_s27, %s2639_s26 }
  0x28   : > { %3482 = sst [smem:[#allocation39_spill]] %s3481_s24  ;;  %p381_p11 = scmp.ne.s32.totalorder %s2639_s26, %s2635_s25 }
  0x29   : > { %s3483_s21 = scalar_select %p2847_p9, 1, 0 }
  0x2a   : > { %p1752_p12 = scmp.ge.s32.totalorder %s2675_s18, 1  ;;  %p389_p13 = scmp.lt.s32.totalorder %s2675_s18, 9 }
  0x2b   : > { %3484 = sst [smem:[#allocation40_spill]] %s3483_s21  ;;  %p2858_p1 = por %p375_p10, %p348_p4 }
  0x2c   : > { %p2862_p3 = por %p381_p11, %p354_p6  ;;  %p2866_p0 = pnand %p1752_p12, %p389_p13 }
  0x2d   : > { %s3485_s20 = scalar_select %p2858_p1, 1, 0 }
  0x2e   : > { %s3487_s13 = scalar_select %p2862_p3, 1, 0 }
  0x2f   : > { %3486 = sst [smem:[#allocation41_spill]] %s3485_s20  ;;  %p2136_p2 = pneg %p2866_p0 }
  0x30   : > { %3488 = sst [smem:[#allocation42_spill]] %s3487_s13  ;;  %s2677_s28 = smov [#allocation13]  }
  0x31   : > { %s401_s21 = sshll.u32 %s2677_s28, 4  ;;  %p3490_p9 = scmp.eq.s32.totalorder %s2822_s19, 0  ;;  %s402_s21 = int_to_ptr.vmem [resolvable:$true] %s401_s21 }
  0x32   : > { %s2302_s13 = scalar_lea.vmem %s402_s21, 6144  ;;  %p2310_p12 = scmp.lt.s32.totalorder %s402_s21, %s402_s21 }
  0x33   : > { %p2874_p8 = pnand %p2136_p2, %p3490_p9  ;;  %p2303_p6 = scmp.ne.s32.totalorder %s402_s21, %s2302_s13 }
  0x34   : > { %p2311_p13 = scmp.lt.s32.totalorder %s2302_s13, %s2302_s13 }
  0x35   : > { %p2293_p4 = pneg %p2874_p8 }
  0x36   : > { %p2312_p3 = por %p2311_p13, %p2310_p12 }
  0x37   : > { %p2305_p10 = pnand %p2303_p6, %p2293_p4 }
  0x39   : > { %p2306_p11 = pneg %p2305_p10 }
  0x3b   : > { %p2313_p1 = pnand %p2312_p3, %p2306_p11 }
  0x3d   : > { %2316 = shalt.err (!%p2313_p1)
}
  0x3e   : > { %s3441_s28 = smov 384   ;;  %s3442_s20 = smov 24  }
  0x3f   : > { %s3492_s5 = sld [smem:[#allocation48_spill]]  ;;  %s53_s15 = sadd.s32 1, %s2671_s17 }
  0x40   : > { %s50_s11 = sadd.s32 1, %s2667_s16  ;;  %p2172_p9 = scmp.lt.s32.totalorder %s2675_s18, 8 }
  0x41   : > { %p51_p3 = scmp.ge.s32.totalorder %s50_s11, 4  ;;  %s2895_s8 = sand.u32 1, %s2655_s30  }
  0x42   : > { %s3453_s13 = sshll.u32 %s2671_s17, 11  ;;  %p2906_p2 = pnand %p2172_p9, %p2833_p5 }
  0x43   : > { %s3553_s11 = smov (%p51_p3, %s50_s11), 0  ;;  %s3555_s15 = smov (!%p51_p3, %s53_s15), %s2671_s17 }
  0x44   : > { %3493 = sst [smem:[#allocation43_spill]] %s3553_s11  ;;  %s361_s24 = ssub.s32 %s2667_s16, %s3553_s11 }
  0x45   : > { %2139 = dma.hbm_to_vmem [thread:$0]  (!%p2874_p8), %s3492_s5, 6144, %s402_s21, [#allocation14], %s3441_s28, %s3441_s28, %s3442_s20  }
  0x46   : > { %p55_p1 = scmp.ge.s32.totalorder %s3555_s15, 2  ;;  %s3496_s1 = sld [smem:[#allocation47_spill]] }
  0x47   : > { %s3497_s22 = sadd.s32 1, %s2655_s30  ;;  %s3499_s14 = sadd.s32 1, %s2643_s27 }
  0x48   : > { %s3557_s15 = smov (%p55_p1, %s3555_s15), 0  ;;  %s3501_s20 = sshll.u32 %s2895_s8, 7 }
  0x49   : > { %3495 = sst [smem:[#allocation44_spill]] %s3557_s15  ;;  %s57_s5 = ssub.s32 %s2671_s17, %s3557_s15 }
  0x4a   : > { %p58_p6 = scmp.eq.s32.totalorder %s57_s5, 0  ;;  %s362_s9 = sor.u32 %s361_s24, %s57_s5 }
  0x4b   : > { %p363_p10 = scmp.eq.s32.totalorder %s362_s9, 0  ;;  %s478_s19 = scalar_lea.vmem [#allocation7], %s3501_s20 }
  0x4c   : > { %s2920_s16 = scalar_lea.hbm %s3496_s1, %s3453_s13  ;;  %s485_s23 = sshll.u32 %s478_s19, 4  ;;  %s486_s23 = int_to_ptr.vmem [resolvable:$true] %s485_s23 }
  0x4d   : > { %s2925_s7 = scalar_select %p58_p6, %s2655_s30, %s3497_s22  }
  0x4e   : > { %s2930_s26 = scalar_select %p363_p10, %s2643_s27, %s3499_s14  }
  0x4f   : > { %3498 = sst [smem:[#allocation45_spill]] %s2925_s7  ;;  %s2935_s29 = sshll.u32 %s2895_s8, 3 }
  0x50   : > { %3500 = sst [smem:[#allocation46_spill]] %s2930_s26  ;;  %s2938_s5 = sshll.u32 %s2671_s17, 7 }
  0x51   : > { %s3502_s9 = sand.u32 1, %s2675_s18   ;;  %p2946_p5 = pneg %p2906_p2 }
  0x52   : > { %s2942_s24 = scalar_lea.sflag [#allocation8], %s3502_s9  ;;  %s2330_s21 = scalar_lea.vmem %s486_s23, 2048 }
  0x53   : > { %p2331_p11 = scmp.ne.s32.totalorder %s486_s23, %s2330_s21  ;;  %s2680_s14 = smov [#allocation7]  }
  0x54   : > { %s2335_s19 = sshll.u32 %s2680_s14, 4  ;;  %s2336_s19 = int_to_ptr.vmem [resolvable:$false] %s2335_s19 }
  0x55   : > { %p2333_p12 = pnand %p2331_p11, %p2946_p5  ;;  %s2337_s20 = scalar_lea.vmem %s2336_s19, 4096 }
  0x56   : > { %p2338_p3 = scmp.lt.s32.totalorder %s486_s23, %s2336_s19  ;;  %p2339_p9 = scmp.lt.s32.totalorder %s2337_s20, %s2330_s21 }
  0x57   : > { %p2334_p13 = pneg %p2333_p12 }
  0x58   : > { %p2340_p1 = por %p2339_p9, %p2338_p3 }
  0x5a   : > { %p2341_p6 = pnand %p2340_p1, %p2334_p13 }
  0x5c   : > { %2344 = shalt.err (!%p2341_p6)
}
  0x5d   : > { %s3458_s22 = smov 128   ;;  %s3459_s9 = smov 8  }
  0x5e   : > { %2152 = dma.hbm_to_vmem [thread:$0]  (!%p2906_p2), %s2920_s16, 2048, %s486_s23, %s2942_s24, %s3458_s22, %s3458_s22, %s3459_s9  }
  0x5f   : > { %s522_s21 = scalar_lea.hbm %s3416_s3, %s2938_s5  ;;  %s517_s20 = scalar_lea.vmem [#allocation10], %s2935_s29 }
  0x60   : > { %s524_s13 = sshll.u32 %s517_s20, 4  ;;  %s3504_s1 = sand.u32 1, %s2675_s18   ;;  %s525_s13 = int_to_ptr.vmem [resolvable:$true] %s524_s13 }
  0x61   : > { %s2966_s15 = scalar_lea.sflag [#allocation11], %s3504_s1  ;;  %s2358_s7 = scalar_lea.vmem %s525_s13, 128 }
  0x62   : > { %p2359_p10 = scmp.ne.s32.totalorder %s525_s13, %s2358_s7  ;;  %s2683_s30 = smov [#allocation10]  }
  0x63   : > { %s2363_s26 = sshll.u32 %s2683_s30, 4  ;;  %s2364_s26 = int_to_ptr.vmem [resolvable:$false] %s2363_s26 }
  0x64   : > { %p2361_p11 = pnand %p2359_p10, %p2946_p5  ;;  %s2365_s27 = scalar_lea.vmem %s2364_s26, 256 }
  0x65   : > { %p2366_p13 = scmp.lt.s32.totalorder %s525_s13, %s2364_s26  ;;  %p2367_p3 = scmp.lt.s32.totalorder %s2365_s27, %s2358_s7 }
  0x66   : > { %p2362_p12 = pneg %p2361_p11 }
  0x67   : > { %p2368_p9 = por %p2367_p3, %p2366_p13 }
  0x69   : > { %p2369_p1 = pnand %p2368_p9, %p2362_p12 }
  0x6b   : > { %2372 = shalt.err (!%p2369_p1)
}
  0x6c   : > { %2158 = dma.hbm_to_vmem [thread:$0]  (!%p2906_p2), %s522_s21, 128, %s525_s13, %s2966_s15  }
  0x6d   : > { %s2684_s1 = smov [#allocation15]   ;;  %s2685_s23 = smov [#allocation16]  }
  0x6e   : > { %s414_s16 = sshll.u32 %s2684_s1, 4  ;;  %s436_s14 = sshll.u32 %s2685_s23, 4  ;;  %s415_s16 = int_to_ptr.vmem [resolvable:$true] %s414_s16  ;;  %s437_s14 = int_to_ptr.vmem [resolvable:$true] %s436_s14 }
  0x6f   : > { %s2384_s19 = scalar_lea.vmem %s415_s16, 6144  ;;  %p2392_p7 = scmp.lt.s32.totalorder %s415_s16, %s415_s16 }
  0x70   : > { %p2385_p6 = scmp.ne.s32.totalorder %s415_s16, %s2384_s19  ;;  %p2393_p13 = scmp.lt.s32.totalorder %s2384_s19, %s2384_s19 }
  0x72   : > { %p2387_p10 = pnand %p2385_p6, %p2293_p4  ;;  %p2394_p12 = por %p2393_p13, %p2392_p7 }
  0x74   : > { %p2388_p11 = pneg %p2387_p10 }
  0x76   : > { %p2395_p3 = pnand %p2394_p12, %p2388_p11 }
  0x78   : > { %2398 = shalt.err (!%p2395_p3)
}
  0x79   : > { %s3505_s7 = smov 24   ;;  %s3506_s26 = smov 384  }
  0x7a   : > { %2142 = dma.hbm_to_vmem [thread:$0]  (!%p2874_p8), %s3419_s6, 6144, %s415_s16, [#allocation14], %s3506_s26, %s3506_s26, %s3505_s7  }
  0x7b   : > { %s2410_s13 = scalar_lea.vmem %s437_s14, 2048  ;;  %p2418_p7 = scmp.lt.s32.totalorder %s437_s14, %s437_s14 }
  0x7c   : > { %p2411_p9 = scmp.ne.s32.totalorder %s437_s14, %s2410_s13  ;;  %p2419_p10 = scmp.lt.s32.totalorder %s2410_s13, %s2410_s13 }
  0x7e   : > { %p2413_p1 = pnand %p2411_p9, %p2293_p4  ;;  %p2420_p11 = por %p2419_p10, %p2418_p7 }
  0x80   : > { %p2414_p6 = pneg %p2413_p1 }
  0x82   : > { %p2421_p13 = pnand %p2420_p11, %p2414_p6 }
  0x84   : > { %2424 = shalt.err (!%p2421_p13)
}
  0x85   : > { %2145 = dma.hbm_to_vmem [thread:$0]  (!%p2874_p8), %s3423_s10, 2048, %s437_s14, [#allocation17], %s3458_s22, %s3458_s22, %s3459_s9  }
  0x86   : > { %s3507_s1 = sshll.u32 %s2671_s17, 11  ;;  %s3508_s7 = sshll.u32 %s2895_s8, 7 }
  0x87   : > { %s463_s19 = scalar_lea.hbm %s3413_s0, %s3507_s1  ;;  %s457_s26 = scalar_lea.vmem [#allocation4], %s3508_s7 }
  0x88   : > { %s464_s25 = sshll.u32 %s457_s26, 4  ;;  %s504_s13 = scalar_lea.hbm %s3415_s2, %s2938_s5  ;;  %s465_s25 = int_to_ptr.vmem [resolvable:$true] %s464_s25 }
  0x89   : > { %s454_s21 = scalar_lea.sflag [#allocation5], %s2895_s8  ;;  %s2438_s20 = scalar_lea.vmem %s465_s25, 2048 }
  0x8a   : > { %p2439_p4 = scmp.ne.s32.totalorder %s465_s25, %s2438_s20  ;;  %s2686_s14 = smov [#allocation4]  }
  0x8b   : > { %s2443_s22 = sshll.u32 %s2686_s14, 4  ;;  %s2444_s22 = int_to_ptr.vmem [resolvable:$false] %s2443_s22 }
  0x8c   : > { %p2441_p12 = pnand %p2439_p4, %p2946_p5  ;;  %s2445_s9 = scalar_lea.vmem %s2444_s22, 4096 }
  0x8d   : > { %p2446_p8 = scmp.lt.s32.totalorder %s465_s25, %s2444_s22  ;;  %p2447_p9 = scmp.lt.s32.totalorder %s2445_s9, %s2438_s20 }
  0x8e   : > { %p2442_p3 = pneg %p2441_p12 }
  0x8f   : > { %p2448_p1 = por %p2447_p9, %p2446_p8 }
  0x91   : > { %p2449_p6 = pnand %p2448_p1, %p2442_p3 }
  0x93   : > { %2452 = shalt.err (!%p2449_p6)
}
  0x94   : > { %s3509_s1 = smov 8   ;;  %s3510_s16 = smov 128  }
  0x95   : > { %2149 = dma.hbm_to_vmem [thread:$0]  (!%p2906_p2), %s463_s19, 2048, %s465_s25, %s454_s21, %s3510_s16, %s3510_s16, %s3509_s1  }
  0x96   : > { %s499_s8 = scalar_lea.vmem [#allocation9], %s2935_s29  ;;  %s540_s22 = scalar_lea.hbm %s3417_s4, %s2938_s5 }
  0x97   : > { %s506_s23 = sshll.u32 %s499_s8, 4  ;;  %s2687_s27 = smov [#allocation9]   ;;  %s507_s23 = int_to_ptr.vmem [resolvable:$true] %s506_s23 }
  0x98   : > { %s2466_s9 = scalar_lea.vmem %s507_s23, 128  ;;  %s2471_s30 = sshll.u32 %s2687_s27, 4  ;;  %s2472_s30 = int_to_ptr.vmem [resolvable:$false] %s2471_s30 }
  0x99   : > { %p2467_p7 = scmp.ne.s32.totalorder %s507_s23, %s2466_s9  ;;  %s2473_s20 = scalar_lea.vmem %s2472_s30, 256 }
  0x9a   : > { %p2474_p13 = scmp.lt.s32.totalorder %s507_s23, %s2472_s30  ;;  %p2475_p4 = scmp.lt.s32.totalorder %s2473_s20, %s2466_s9 }
  0x9b   : > { %p2469_p10 = pnand %p2467_p7, %p2946_p5 }
  0x9c   : > { %p2476_p12 = por %p2475_p4, %p2474_p13 }
  0x9d   : > { %p2470_p11 = pneg %p2469_p10 }
  0x9f   : > { %p2477_p3 = pnand %p2476_p12, %p2470_p11 }
  0xa1   : > { %2480 = shalt.err (!%p2477_p3)
}
  0xa2   : > { %2155 = dma.hbm_to_vmem [thread:$0]  (!%p2906_p2), %s504_s13, 128, %s507_s23, %s2942_s24  }
  0xa3   : > { %s535_s21 = scalar_lea.vmem [#allocation12], %s2935_s29  ;;  %s2688_s16 = smov [#allocation12]  }
  0xa4   : > { %s542_s14 = sshll.u32 %s535_s21, 4  ;;  %s2499_s8 = sshll.u32 %s2688_s16, 4  ;;  %s543_s14 = int_to_ptr.vmem [resolvable:$true] %s542_s14  ;;  %s2500_s8 = int_to_ptr.vmem [resolvable:$false] %s2499_s8 }
  0xa5   : > { %s2494_s1 = scalar_lea.vmem %s543_s14, 128  ;;  %s2501_s7 = scalar_lea.vmem %s2500_s8, 256 }
  0xa6   : > { %p2495_p8 = scmp.ne.s32.totalorder %s543_s14, %s2494_s1  ;;  %p2502_p6 = scmp.lt.s32.totalorder %s543_s14, %s2500_s8 }
  0xa7   : > { %p2503_p7 = scmp.lt.s32.totalorder %s2501_s7, %s2494_s1 }
  0xa8   : > { %p2497_p9 = pnand %p2495_p8, %p2946_p5 }
  0xa9   : > { %p2504_p10 = por %p2503_p7, %p2502_p6 }
  0xaa   : > { %p2498_p1 = pneg %p2497_p9 }
  0xac   : > { %p2505_p11 = pnand %p2504_p10, %p2498_p1 }
  0xae   : > { %2508 = shalt.err (!%p2505_p11)
}
  0xaf   : > { %2161 = dma.hbm_to_vmem [thread:$0]  (!%p2906_p2), %s540_s22, 128, %s543_s14, %s2966_s15  }
  0xb0   : > { %551 = sbr.rel (%p2866_p0) target bundleno = 1829 (0x725), region = 68  ;;  %s3511_s11 = sld [smem:[#allocation32_spill]] (!%p2866_p0) }
  0xb1   : > { %s3512_s13 = sld [smem:[#allocation38_spill]] (!%p2866_p0) }
  0xb6   : > { %s3043_s23 = sand.u32 1, %s3511_s11  }
  0xb7   : > { %s1770_s26 = sshll.u32 %s3043_s23, 7  ;;  %s554_s9 = scalar_lea.sflag [#allocation5], %s3043_s23 }
  0xb8   : > { %s3047_s27 = scalar_lea.vmem [#allocation4], %s1770_s26  ;;  %p3513_p5 = scmp.ne.s32.totalorder %s3512_s13, 0 }
  0xba   : > { %2606 = dma.done.wait (%p3513_p5), %s554_s9, 2048  }
  0xbb   : > { %2608 = vsyncadd (%p3513_p5), %s554_s9, 4294965248  ;;  %s3514_s28 = sld [smem:[#allocation37_spill]]  ;;  %s3054_s5 = scalar_lea.vmem [#allocation7], %s1770_s26 }
  0xc1   : > { %s562_s15 = sand.u32 1, %s3514_s28  }
  0xc2   : > { %s563_s12 = scalar_lea.sflag [#allocation8], %s562_s15 }
  0xc3   : > { %2610 = dma.done.wait (%p3513_p5), %s563_s12, 2176  }
  0xc4   : > { %2612 = vsyncadd (%p3513_p5), %s563_s12, 4294965120  ;;  %s3061_s22 = sshll.u32 %s3043_s23, 3  ;;  %s581_s20 = scalar_lea.sflag [#allocation11], %s562_s15 }
  0xc5   : > { %s575_s30 = scalar_lea.vmem [#allocation9], %s3061_s22  ;;  %s584_s19 = scalar_lea.vmem [#allocation10], %s3061_s22 }
  0xc6   : > { %2614 = dma.done.wait (%p3513_p5), %s581_s20, 256  }
  0xc7   : > { %2616 = vsyncadd (%p3513_p5), %s581_s20, 4294967040  ;;  %s593_s25 = scalar_lea.vmem [#allocation12], %s3061_s22  ;;  %p3515_p0 = scmp.eq.s32.totalorder %s3514_s28, 0 }
  0xc9   : > { %2618 = dma.done.wait (%p3515_p0), [#allocation14], 12288   ;;  %p3516_p2 = pmov %p3515_p0 }
  0xca   : > { %p3517_p13 = pmov %p3515_p0 }
  0xcb   : > { %2620 = vsyncadd (%p3516_p2), [#allocation14], 4294955008 }
  0xcc   : > { %2622 = dma.done.wait (%p3517_p13), [#allocation17], 2048   ;;  %p3518_p4 = pmov %p3515_p0 }
  0xcd   : > { %s3519_s21 = sld [smem:[#allocation29_spill]]  ;;  %s665_s16 = scalar_lea.vmem [#allocation18], %s3061_s22 }
  0xce   : > { %2624 = vsyncadd (%p3518_p4), [#allocation17], 4294965248  ;;  %s3520_s7 = sld [smem:[#allocation34_spill]] }
  0xd3   : > { %s670_s14 = sand.u32 1, %s3519_s21  }
  0xd4   : > { %s3081_s1 = sshll.u32 %s670_s14, 3  ;;  %p1780_p12 = scmp.ne.s32.totalorder %s3520_s7, 0 }
  0xd5   : > { %s672_s8 = scalar_lea.vmem [#allocation19], %s3081_s1 }
  0xd6   : > { %676 = sbr.rel (%p1780_p12) target bundleno = 221 (0xdd), region = 104 }
  0xdb   : > { %v677_v0 = vld [vmem:[%s584_s19] sm:$0xff]  ;;  %v679_v1 = vld [vmem:[%s593_s25] sm:$0xff] }
  0xdc   : > { %678 = vst [vmem:[#allocation2] sm:$0xff] %v677_v0  ;;  %680 = vst [vmem:[#allocation3] sm:$0xff] %v679_v1 }
  0xdd PF: > { %v745_v2 = vld [vmem:[#allocation13 + $0x170] sm:$0xff]  ;;  %v744_v3 = vld [vmem:[#allocation13 + $0x168] sm:$0xff]  ;;  %v742_v4 = vld [vmem:[#allocation13 + $0x158] sm:$0xff]  ;;  %v2689_v6 = vmov 0.0   ;;  %vm2690_vm0 = vmmov 0   ;;  %s3521_s11 = sld [smem:[#allocation49_spill]] }
  0xde   : > { %747 = vmatprep.subr.mxu0 %v745_v2  ;;  %v741_v5 = vld [vmem:[#allocation13 + $0x150] sm:$0xff]  ;;  %811 = vmatprep.mubr.f32.mxu0 %v2689_v6  ;;  %v739_v7 = vld [vmem:[#allocation13 + $0x140] sm:$0xff]  ;;  %v738_v8 = vld [vmem:[#allocation13 + $0x138] sm:$0xff]  ;;  %s3522_s9 = sld [smem:[#allocation51_spill]] }
  0xdf   : > { %748 = vmatpush1.msra.mxu0 %v744_v3  ;;  %1900 = vmatprep.subr.mxu1 %v2689_v6  ;;  %v736_v9 = vld [vmem:[#allocation13 + $0x128] sm:$0xff]  ;;  %v735_v10 = vld [vmem:[#allocation13 + $0x120] sm:$0xff]  ;;  %v733_v11 = vld [vmem:[#allocation13 + $0x110] sm:$0xff]  ;;  %s3523_s15 = sld [smem:[#allocation50_spill]] }
  0xe0   : > { %749 = vmatprep.subr.mxu0 %v742_v4  ;;  %1932 = vmatprep.mubr.msk.f32.mxu1 %vm2690_vm0, %v2689_v6  ;;  %v732_v12 = vld [vmem:[#allocation13 + $0x108] sm:$0xff]  ;;  %v730_v13 = vld [vmem:[#allocation13 + $0xf8] sm:$0xff]  ;;  %v729_v14 = vld [vmem:[#allocation13 + $0xf0] sm:$0xff]  ;;  %s3525_s20 = sld [smem:[#allocation52_spill]] (!%p1780_p12) }
  0xe1   : > { %750 = vmatpush1.msra.mxu0 %v741_v5  ;;  %v727_v15 = vld [vmem:[#allocation13 + $0xe0] sm:$0xff]  ;;  %v726_v16 = vld [vmem:[#allocation13 + $0xd8] sm:$0xff]  ;;  %v724_v18 = vld [vmem:[#allocation13 + $0xc8] sm:$0xff] }
  0xe2   : > { %751 = vmatprep.subr.mxu0 %v739_v7  ;;  %v746_v17 = vld [vmem:[#allocation13 + $0x178] sm:$0xff]  ;;  %v743_v19 = vld [vmem:[#allocation13 + $0x160] sm:$0xff]  ;;  %v740_v21 = vld [vmem:[#allocation13 + $0x148] sm:$0xff] }
  0xe3   : > { %752 = vmatpush1.msra.mxu0 %v738_v8  ;;  %1901 = vmatpush3.msra.mxu1 %v746_v17  ;;  %v723_v20 = vld [vmem:[#allocation13 + $0xc0] sm:$0xff]  ;;  %v721_v22 = vld [vmem:[#allocation13 + $0xb0] sm:$0xff]  ;;  %v720_v23 = vld [vmem:[#allocation13 + $0xa8] sm:$0xff] }
  0xe4   : > { %753 = vmatprep.subr.mxu0 %v736_v9  ;;  %1902 = vmatprep.subr.mxu1 %v2689_v6  ;;  %v737_v24 = vld [vmem:[#allocation13 + $0x130] sm:$0xff]  ;;  %v718_v25 = vld [vmem:[#allocation13 + $0x98] sm:$0xff]  ;;  %v715_v28 = vld [vmem:[#allocation13 + $0x80] sm:$0xff] }
  0xe5   : > { %754 = vmatpush1.msra.mxu0 %v735_v10  ;;  %1903 = vmatpush3.msra.mxu1 %v743_v19  ;;  %v717_v26 = vld [vmem:[#allocation13 + $0x90] sm:$0xff]  ;;  %v734_v27 = vld [vmem:[#allocation13 + $0x118] sm:$0xff]  ;;  %v731_v30 = vld [vmem:[#allocation13 + $0x100] sm:$0xff] }
  0xe6   : > { %755 = vmatprep.subr.mxu0 %v733_v11  ;;  %1904 = vmatprep.subr.mxu1 %v2689_v6  ;;  %v714_v29 = vld [vmem:[#allocation13 + $0x78] sm:$0xff]  ;;  %v712_v31 = vld [vmem:[#allocation13 + $0x68] sm:$0xff]  ;;  %v711_v32 = vld [vmem:[#allocation13 + $0x60] sm:$0xff] }
  0xe7   : > { %756 = vmatpush1.msra.mxu0 %v732_v12  ;;  %1905 = vmatpush3.msra.mxu1 %v740_v21  ;;  %v728_v33 = vld [vmem:[#allocation13 + $0xe8] sm:$0xff]  ;;  %v709_v34 = vld [vmem:[#allocation13 + $0x50] sm:$0xff]  ;;  %v706_v37 = vld [vmem:[#allocation13 + $0x38] sm:$0xff] }
  0xe8   : > { %757 = vmatprep.subr.mxu0 %v730_v13  ;;  %1906 = vmatprep.subr.mxu1 %v2689_v6  ;;  %v708_v35 = vld [vmem:[#allocation13 + $0x48] sm:$0xff]  ;;  %v725_v36 = vld [vmem:[#allocation13 + $0xd0] sm:$0xff]  ;;  %v722_v39 = vld [vmem:[#allocation13 + $0xb8] sm:$0xff] }
  0xe9   : > { %758 = vmatpush1.msra.mxu0 %v729_v14  ;;  %1907 = vmatpush3.msra.mxu1 %v737_v24  ;;  %v705_v38 = vld [vmem:[#allocation13 + $0x30] sm:$0xff]  ;;  %v703_v40 = vld [vmem:[#allocation13 + $0x20] sm:$0xff]  ;;  %v702_v41 = vld [vmem:[#allocation13 + $0x18] sm:$0xff] }
  0xea   : > { %759 = vmatprep.subr.mxu0 %v727_v15  ;;  %1908 = vmatprep.subr.mxu1 %v2689_v6  ;;  %v719_v42 = vld [vmem:[#allocation13 + $0xa0] sm:$0xff]  ;;  %v700_v43 = vld [vmem:[#allocation13 + $0x8] sm:$0xff]  ;;  %v934_v47 = vld [vmem:[#allocation15 + $0x170] sm:$0xff] }
  0xeb   : > { %760 = vmatpush1.msra.mxu0 %v726_v16  ;;  %1909 = vmatpush3.msra.mxu1 %v734_v27  ;;  %v699_v44 = vld [vmem:[#allocation13] sm:$0xff]  ;;  %v716_v45 = vld [vmem:[#allocation13 + $0x88] sm:$0xff]  ;;  %v931_v49 = vld [vmem:[#allocation15 + $0x158] sm:$0xff] }
  0xec   : > { %761 = vmatprep.subr.mxu0 %v724_v18  ;;  %1910 = vmatprep.subr.mxu1 %v2689_v6  ;;  %v697_v46 = vld [vmem:[#allocation2] sm:$0xff]  ;;  %v933_v48 = vld [vmem:[#allocation15 + $0x168] sm:$0xff]  ;;  %v713_v50 = vld [vmem:[#allocation13 + $0x70] sm:$0xff] }
  0xed   : > { %762 = vmatpush1.msra.mxu0 %v723_v20  ;;  %1911 = vmatpush3.msra.mxu1 %v731_v30  ;;  %v930_v51 = vld [vmem:[#allocation15 + $0x150] sm:$0xff]  ;;  %v928_v52 = vld [vmem:[#allocation15 + $0x140] sm:$0xff]  ;;  %v710_v53 = vld [vmem:[#allocation13 + $0x58] sm:$0xff] }
  0xee   : > { %763 = vmatprep.subr.mxu0 %v721_v22  ;;  %1912 = vmatprep.subr.mxu1 %v2689_v6  ;;  %v927_v54 = vld [vmem:[#allocation15 + $0x138] sm:$0xff]  ;;  %v925_v55 = vld [vmem:[#allocation15 + $0x128] sm:$0xff]  ;;  %v707_v56 = vld [vmem:[#allocation13 + $0x40] sm:$0xff] }
  0xef   : > { %764 = vmatpush1.msra.mxu0 %v720_v23  ;;  %1913 = vmatpush3.msra.mxu1 %v728_v33  ;;  %v924_v57 = vld [vmem:[#allocation15 + $0x120] sm:$0xff]  ;;  %v922_v58 = vld [vmem:[#allocation15 + $0x110] sm:$0xff]  ;;  %v704_v59 = vld [vmem:[#allocation13 + $0x28] sm:$0xff] }
  0xf0   : > { %765 = vmatprep.subr.mxu0 %v718_v25  ;;  %1914 = vmatprep.subr.mxu1 %v2689_v6  ;;  %v921_v60 = vld [vmem:[#allocation15 + $0x108] sm:$0xff]  ;;  %v919_v61 = vld [vmem:[#allocation15 + $0xf8] sm:$0xff]  ;;  %v701_v62 = vld [vmem:[#allocation13 + $0x10] sm:$0xff] }
  0xf1   : > { %766 = vmatpush1.msra.mxu0 %v717_v26  ;;  %1915 = vmatpush3.msra.mxu1 %v725_v36  ;;  %v918_v63 = vld [vmem:[#allocation15 + $0xf0] sm:$0xff]  ;;  %v916_v0 = vld [vmem:[#allocation15 + $0xe0] sm:$0xff]  ;;  %v915_v1 = vld [vmem:[#allocation15 + $0xd8] sm:$0xff] }
  0xf2   : > { %767 = vmatprep.subr.mxu0 %v715_v28  ;;  %1916 = vmatprep.subr.mxu1 %v2689_v6  ;;  %v913_v2 = vld [vmem:[#allocation15 + $0xc8] sm:$0xff]  ;;  %v935_v3 = vld [vmem:[#allocation15 + $0x178] sm:$0xff]  ;;  %v912_v4 = vld [vmem:[#allocation15 + $0xc0] sm:$0xff] }
  0xf3   : > { %768 = vmatpush1.msra.mxu0 %v714_v29  ;;  %1917 = vmatpush3.msra.mxu1 %v722_v39  ;;  %v910_v5 = vld [vmem:[#allocation15 + $0xb0] sm:$0xff]  ;;  %v932_v7 = vld [vmem:[#allocation15 + $0x160] sm:$0xff]  ;;  %v909_v8 = vld [vmem:[#allocation15 + $0xa8] sm:$0xff] }
  0xf4   : > { %769 = vmatprep.subr.mxu0 %v712_v31  ;;  %1918 = vmatprep.subr.mxu1 %v2689_v6  ;;  %v907_v9 = vld [vmem:[#allocation15 + $0x98] sm:$0xff]  ;;  %v929_v10 = vld [vmem:[#allocation15 + $0x148] sm:$0xff]  ;;  %v906_v11 = vld [vmem:[#allocation15 + $0x90] sm:$0xff] }
  0xf5   : > { %770 = vmatpush1.msra.mxu0 %v711_v32  ;;  %1919 = vmatpush3.msra.mxu1 %v719_v42  ;;  %v904_v12 = vld [vmem:[#allocation15 + $0x80] sm:$0xff]  ;;  %v926_v13 = vld [vmem:[#allocation15 + $0x130] sm:$0xff]  ;;  %v903_v14 = vld [vmem:[#allocation15 + $0x78] sm:$0xff] }
  0xf6   : > { %771 = vmatprep.subr.mxu0 %v709_v34  ;;  %1920 = vmatprep.subr.mxu1 %v2689_v6  ;;  %v901_v15 = vld [vmem:[#allocation15 + $0x68] sm:$0xff]  ;;  %v923_v16 = vld [vmem:[#allocation15 + $0x118] sm:$0xff]  ;;  %v900_v17 = vld [vmem:[#allocation15 + $0x60] sm:$0xff] }
  0xf7   : > { %772 = vmatpush1.msra.mxu0 %v708_v35  ;;  %1921 = vmatpush3.msra.mxu1 %v716_v45  ;;  %v898_v18 = vld [vmem:[#allocation15 + $0x50] sm:$0xff]  ;;  %v920_v19 = vld [vmem:[#allocation15 + $0x100] sm:$0xff]  ;;  %v897_v20 = vld [vmem:[#allocation15 + $0x48] sm:$0xff] }
  0xf8   : > { %773 = vmatprep.subr.mxu0 %v706_v37  ;;  %1922 = vmatprep.subr.mxu1 %v2689_v6  ;;  %v895_v21 = vld [vmem:[#allocation15 + $0x38] sm:$0xff]  ;;  %v917_v22 = vld [vmem:[#allocation15 + $0xe8] sm:$0xff]  ;;  %v894_v23 = vld [vmem:[#allocation15 + $0x30] sm:$0xff] }
  0xf9   : > { %774 = vmatpush1.msra.mxu0 %v705_v38  ;;  %1923 = vmatpush3.msra.mxu1 %v713_v50  ;;  %v892_v24 = vld [vmem:[#allocation15 + $0x20] sm:$0xff]  ;;  %v914_v25 = vld [vmem:[#allocation15 + $0xd0] sm:$0xff]  ;;  %v891_v26 = vld [vmem:[#allocation15 + $0x18] sm:$0xff] }
  0xfa   : > { %775 = vmatprep.subr.mxu0 %v703_v40  ;;  %1924 = vmatprep.subr.mxu1 %v2689_v6  ;;  %v889_v27 = vld [vmem:[#allocation15 + $0x8] sm:$0xff]  ;;  %v911_v28 = vld [vmem:[#allocation15 + $0xb8] sm:$0xff]  ;;  %v888_v29 = vld [vmem:[#allocation15] sm:$0xff] }
  0xfb   : > { %776 = vmatpush1.msra.mxu0 %v702_v41  ;;  %1925 = vmatpush3.msra.mxu1 %v710_v53  ;;  %v3116_v30 = vld [vmem:[#allocation3] sm:$0xff]  ;;  %v908_v31 = vld [vmem:[#allocation15 + $0xa0] sm:$0xff]  ;;  %v902_v33 = vld [vmem:[#allocation15 + $0x70] sm:$0xff] }
  0xfc   : > { %777 = vmatprep.subr.mxu0 %v700_v43  ;;  %1926 = vmatprep.subr.mxu1 %v2689_v6  ;;  %v905_v32 = vld [vmem:[#allocation15 + $0x88] sm:$0xff]  ;;  %v899_v34 = vld [vmem:[#allocation15 + $0x58] sm:$0xff]  ;;  %v896_v35 = vld [vmem:[#allocation15 + $0x40] sm:$0xff] }
  0xfd   : > { %778 = vmatpush1.msra.mxu0 %v699_v44  ;;  %1927 = vmatpush3.msra.mxu1 %v707_v56  ;;  %v893_v36 = vld [vmem:[#allocation15 + $0x28] sm:$0xff]  ;;  %v890_v37 = vld [vmem:[#allocation15 + $0x10] sm:$0xff]  ;;  %v3142_v39 = vld [vmem:[%s3047_s27 + $0x70] sm:$0xff]  ;;  %v1081_v56 = vlaneseq }
  0xfe   : > { %812 = vmatmul.mubr.f32.vlgmr.msra.gmra.mxu0 %v697_v46  ;;  %936 = vmatprep.subr.mxu0 %v934_v47  ;;  %v3137_v38 = vld [vmem:[%s3047_s27 + $0x78] sm:$0xff]  ;;  %v3147_v40 = vld [vmem:[%s3047_s27 + $0x68] sm:$0xff]  ;;  %v3152_v41 = vld [vmem:[%s3047_s27 + $0x60] sm:$0xff] }
  0xff   : > { %937 = vmatpush1.msra.mxu0 %v933_v48  ;;  %1928 = vmatprep.subr.mxu1 %v2689_v6  ;;  %v3157_v42 = vld [vmem:[%s3047_s27 + $0x58] sm:$0xff]  ;;  %v3162_v43 = vld [vmem:[%s3047_s27 + $0x50] sm:$0xff]  ;;  %v3167_v44 = vld [vmem:[%s3047_s27 + $0x48] sm:$0xff] }
 0x100   : > { %938 = vmatprep.subr.mxu0 %v931_v49  ;;  %1929 = vmatpush3.msra.mxu1 %v704_v59  ;;  %v3172_v45 = vld [vmem:[%s3047_s27 + $0x40] sm:$0xff]  ;;  %v3182_v47 = vld [vmem:[%s3047_s27 + $0x30] sm:$0xff]  ;;  %v3187_v48 = vld [vmem:[%s3047_s27 + $0x28] sm:$0xff] }
 0x101   : > { %939 = vmatpush1.msra.mxu0 %v930_v51  ;;  %1930 = vmatprep.subr.mxu1 %v2689_v6  ;;  %v3192_v49 = vld [vmem:[%s3047_s27 + $0x20] sm:$0xff]  ;;  %v3197_v50 = vld [vmem:[%s3047_s27 + $0x18] sm:$0xff]  ;;  %v3202_v51 = vld [vmem:[%s3047_s27 + $0x10] sm:$0xff] }
 0x102   : > { %940 = vmatprep.subr.mxu0 %v928_v52  ;;  %1931 = vmatpush3.msra.mxu1 %v701_v62  ;;  %v3207_v52 = vld [vmem:[%s3047_s27 + $0x8] sm:$0xff]  ;;  %v3212_v53 = vld [vmem:[%s3047_s27] sm:$0xff] }
 0x103   : > { %941 = vmatpush1.msra.mxu0 %v927_v54  ;;  %1000 = vmatprep.mubr.f32.mxu0 %v2689_v6 }
 0x104   : > { %942 = vmatprep.subr.mxu0 %v925_v55  ;;  %1935 = vmatprep.subr.mxu1 %v2689_v6 }
 0x105   : > { %943 = vmatpush1.msra.mxu0 %v924_v57  ;;  %1933 = vmatmul.mubr.f32.vlgmr.msra.gmra.mxu1 %v697_v46  ;;  %v3177_v46 = vld [vmem:[%s3047_s27 + $0x38] sm:$0xff]  ;;  %v1082_v57 = vshrl.u32 %v1081_v56, 7 }
 0x106   : > { %944 = vmatprep.subr.mxu0 %v922_v58  ;;  %1936 = vmatpush3.msra.mxu1 %v935_v3 }
 0x107   : > { %945 = vmatpush1.msra.mxu0 %v921_v60  ;;  %1937 = vmatprep.subr.mxu1 %v2689_v6  ;;  %v1083_v59 = vsub.s32 0, %v1082_v57  ;;  %v1079_v60 = vld [vmem:[%s3521_s11] sm:$0x3] }
 0x108   : > { %946 = vmatprep.subr.mxu0 %v919_v61  ;;  %1938 = vmatpush3.msra.mxu1 %v932_v7 }
 0x109   : > { %947 = vmatpush1.msra.mxu0 %v918_v63  ;;  %1939 = vmatprep.subr.mxu1 %v2689_v6  ;;  %v1084_v62 = vrot.slane %v1079_v60, %v1083_v59  ;;  %v1233_v59 = vld [vmem:[%s3054_s5 + $0x50] sm:$0xff] }
 0x10a   : > { %948 = vmatprep.subr.mxu0 %v916_v0  ;;  %1940 = vmatpush3.msra.mxu1 %v929_v10 }
 0x10b   : > { %949 = vmatpush1.msra.mxu0 %v915_v1  ;;  %1941 = vmatprep.subr.mxu1 %v2689_v6  ;;  %v1087_v1 = vsub.s32 1, %v1082_v57  ;;  %v1236_v57 = vld [vmem:[%s3054_s5 + $0x68] sm:$0xff] }
 0x10c   : > { %950 = vmatprep.subr.mxu0 %v913_v2  ;;  %1942 = vmatpush3.msra.mxu1 %v926_v13 }
 0x10d   : > { %951 = vmatpush1.msra.mxu0 %v912_v4  ;;  %1943 = vmatprep.subr.mxu1 %v2689_v6  ;;  %v1088_v7 = vrot.slane %v1079_v60, %v1087_v1  ;;  %v1232_v60 = vld [vmem:[%s3054_s5 + $0x48] sm:$0xff]  ;;  %v1227_v1 = vld [vmem:[%s3054_s5 + $0x20] sm:$0xff] }
 0x10e   : > { %952 = vmatprep.subr.mxu0 %v910_v5  ;;  %1944 = vmatpush3.msra.mxu1 %v923_v16 }
 0x10f   : > { %953 = vmatpush1.msra.mxu0 %v909_v8  ;;  %1945 = vmatprep.subr.mxu1 %v2689_v6 }
 0x110   : > { %954 = vmatprep.subr.mxu0 %v907_v9  ;;  %1946 = vmatpush3.msra.mxu1 %v920_v19 }
 0x111   : > { %955 = vmatpush1.msra.mxu0 %v906_v11  ;;  %1947 = vmatprep.subr.mxu1 %v2689_v6 }
 0x112   : > { %956 = vmatprep.subr.mxu0 %v904_v12  ;;  %1948 = vmatpush3.msra.mxu1 %v917_v22 }
 0x113   : > { %957 = vmatpush1.msra.mxu0 %v903_v14  ;;  %1949 = vmatprep.subr.mxu1 %v2689_v6 }
 0x114   : > { %958 = vmatprep.subr.mxu0 %v901_v15  ;;  %1950 = vmatpush3.msra.mxu1 %v914_v25  ;;  %v1784_v15 = vld [vmem:[%s3522_s9] ss:$0 sm:$0xff] }
 0x115   : > { %959 = vmatpush1.msra.mxu0 %v900_v17  ;;  %1951 = vmatprep.subr.mxu1 %v2689_v6 }
 0x116   : > { %960 = vmatprep.subr.mxu0 %v898_v18  ;;  %1952 = vmatpush3.msra.mxu1 %v911_v28  ;;  %v1783_v18 = vld [vmem:[%s3523_s15] ss:$0 sm:$0xff] }
 0x117   : > { %961 = vmatpush1.msra.mxu0 %v897_v20  ;;  %1953 = vmatprep.subr.mxu1 %v2689_v6 }
 0x118   : > { %962 = vmatprep.subr.mxu0 %v895_v21  ;;  %1954 = vmatpush3.msra.mxu1 %v908_v31 }
 0x119   : > { %963 = vmatpush1.msra.mxu0 %v894_v23  ;;  %1955 = vmatprep.subr.mxu1 %v2689_v6 }
 0x11a   : > { %964 = vmatprep.subr.mxu0 %v892_v24  ;;  %1967 = vmatprep.mubr.msk.f32.mxu1 %vm2690_vm0, %v2689_v6 }
 0x11b   : > { %965 = vmatpush1.msra.mxu0 %v891_v26  ;;  %1956 = vmatpush3.msra.mxu1 %v905_v32 }
 0x11c   : > { %966 = vmatprep.subr.mxu0 %v889_v27  ;;  %1957 = vmatprep.subr.mxu1 %v2689_v6 }
 0x11d   : > { %967 = vmatpush1.msra.mxu0 %v888_v29  ;;  %1958 = vmatpush3.msra.mxu1 %v902_v33  ;;  %v1129_v29 = vld [vmem:[%s575_s30] sm:$0xff] }
 0x11e   : > { %1001 = vmatmul.mubr.f32.vlgmr.msra.gmra.mxu0 %v3116_v30  ;;  %1970 = vmatprep.subr.mxu0 %v2689_v6 }
 0x11f   : > { %2002 = vmatprep.mubr.msk.f32.mxu0 %vm2690_vm0, %v2689_v6  ;;  %1959 = vmatprep.subr.mxu1 %v2689_v6 }
 0x120   : > { %1960 = vmatpush3.msra.mxu1 %v899_v34  ;;  %1971 = vmatpush3.xpose.msra.mxu0 %v3137_v38  ;;  %v3227_v34 = vand.u32 127, %v1081_v56  ;;  %v1235_v56 = vld [vmem:[%s3054_s5 + $0x60] sm:$0xff] }
 0x121   : > { %1961 = vmatprep.subr.mxu1 %v2689_v6  ;;  %1972 = vmatprep.subr.mxu0 %v2689_v6 }
 0x122   : > { %1962 = vmatpush3.msra.mxu1 %v896_v35 }
 0x123   : > { %1963 = vmatprep.subr.mxu1 %v2689_v6 }
 0x124   : > { %1964 = vmatpush3.msra.mxu1 %v893_v36  ;;  %1973 = vmatpush3.xpose.msra.mxu0 %v3142_v39 }
 0x125   : > { %1965 = vmatprep.subr.mxu1 %v2689_v6  ;;  %1974 = vmatprep.subr.mxu0 %v2689_v6 }
 0x126   : > { %1966 = vmatpush3.msra.mxu1 %v890_v37 }
 0x127   : > { %1968 = vmatmul.mubr.f32.vlgmr.msra.gmra.mxu1 %v3116_v30  ;;  %2005 = vmatprep.subr.mxu1 %v2689_v6 }
 0x128   : > { %2037 = vmatprep.mubr.msk.f32.mxu1 %vm2690_vm0, %v2689_v6  ;;  %1975 = vmatpush3.xpose.msra.mxu0 %v3147_v40 }
 0x129   : > { %1976 = vmatprep.subr.mxu0 %v2689_v6 }
 0x12c   : > { %1977 = vmatpush3.xpose.msra.mxu0 %v3152_v41 }
 0x12d   : > { %1978 = vmatprep.subr.mxu0 %v2689_v6 }
 0x130   : > { %1979 = vmatpush3.xpose.msra.mxu0 %v3157_v42 }
 0x131   : > { %1980 = vmatprep.subr.mxu0 %v2689_v6 }
 0x134   : > { %1981 = vmatpush3.xpose.msra.mxu0 %v3162_v43 }
 0x135   : > { %1982 = vmatprep.subr.mxu0 %v2689_v6 }
 0x138   : > { %1983 = vmatpush3.xpose.msra.mxu0 %v3167_v44 }
 0x139   : > { %1984 = vmatprep.subr.mxu0 %v2689_v6 }
 0x13c   : > { %1985 = vmatpush3.xpose.msra.mxu0 %v3172_v45 }
 0x13d   : > { %1986 = vmatprep.subr.mxu0 %v2689_v6 }
 0x140   : > { %1987 = vmatpush3.xpose.msra.mxu0 %v3177_v46 }
 0x141   : > { %1988 = vmatprep.subr.mxu0 %v2689_v6 }
 0x144   : > { %1989 = vmatpush3.xpose.msra.mxu0 %v3182_v47 }
 0x145   : > { %1990 = vmatprep.subr.mxu0 %v2689_v6 }
 0x148   : > { %1991 = vmatpush3.xpose.msra.mxu0 %v3187_v48 }
 0x149   : > { %1992 = vmatprep.subr.mxu0 %v2689_v6 }
 0x14c   : > { %1993 = vmatpush3.xpose.msra.mxu0 %v3192_v49 }
 0x14d   : > { %1994 = vmatprep.subr.mxu0 %v2689_v6 }
 0x150   : > { %1995 = vmatpush3.xpose.msra.mxu0 %v3197_v50 }
 0x151   : > { %1996 = vmatprep.subr.mxu0 %v2689_v6 }
 0x154   : > { %1997 = vmatpush3.xpose.msra.mxu0 %v3202_v51 }
 0x155   : > { %1998 = vmatprep.subr.mxu0 %v2689_v6 }
 0x158   : > { %1999 = vmatpush3.xpose.msra.mxu0 %v3207_v52 }
 0x159   : > { %2000 = vmatprep.subr.mxu0 %v2689_v6 }
 0x15c   : > { %2001 = vmatpush3.xpose.msra.mxu0 %v3212_v53 }
 0x1be   : > { %v813_v58 = vpop.f32.mrf.mxu0 }
 0x1c0   : > { %v815_v61 = vpop.f32.mrf.mxu0 }
 0x1c5   : > { %v884_v54 = vpop.f32.mrf.mxu1 }
 0x1c6   : > { %v1112_v20 = vadd.f32 %v1783_v18, %v884_v54  ;;  %v1238_v54 = vld [vmem:[%s3054_s5 + $0x78] sm:$0xff] }
 0x1c7   : > { %v1934_v55 = vpop.f32.mrf.mxu1  ;;  %2006 = vmatpush3.msra.mxu1 %v1238_v54 }
 0x1c8   : > { %v1237_v55 = vld [vmem:[%s3054_s5 + $0x70] sm:$0xff]  ;;  %2007 = vmatprep.subr.mxu1 %v2689_v6 }
 0x1c9   : > { %2008 = vmatpush3.msra.mxu1 %v1237_v55 }
 0x1ca   : > { %2009 = vmatprep.subr.mxu1 %v2689_v6 }
 0x1cb   : > { %2010 = vmatpush3.msra.mxu1 %v1236_v57 }
 0x1cc   : > { %2011 = vmatprep.subr.mxu1 %v2689_v6 }
 0x1cd   : > { %2012 = vmatpush3.msra.mxu1 %v1235_v56 }
 0x1ce   : > { %2013 = vmatprep.subr.mxu1 %v2689_v6 }
 0x1de   : > { %v1002_v63 = vpop.f32.mrf.mxu0 }
 0x1df   : > { %v1077_v0 = vadd.f32 %v1002_v63, %v813_v58  ;;  %v1234_v58 = vld [vmem:[%s3054_s5 + $0x58] sm:$0xff]  ;;  %v1229_v63 = vld [vmem:[%s3054_s5 + $0x30] sm:$0xff] }
 0x1e0   : > { %v1004_v2 = vpop.f32.mrf.mxu0  ;;  %2014 = vmatpush3.msra.mxu1 %v1234_v58 }
 0x1e1   : > { %v1091_v3 = vadd.f32 %v1084_v62, %v1077_v0  ;;  %v1078_v5 = vadd.f32 %v1004_v2, %v815_v61  ;;  %2015 = vmatprep.subr.mxu1 %v2689_v6  ;;  %v1231_v61 = vld [vmem:[%s3054_s5 + $0x40] sm:$0xff]  ;;  %v1230_v62 = vld [vmem:[%s3054_s5 + $0x38] sm:$0xff]  ;;  %v1228_v0 = vld [vmem:[%s3054_s5 + $0x28] sm:$0xff] }
 0x1e2   : > { %2016 = vmatpush3.msra.mxu1 %v1233_v59  ;;  %v1226_v2 = vld [vmem:[%s3054_s5 + $0x18] sm:$0xff] }
 0x1e3   : > { %v1781_v4 = vmul.f32 -1.442695, %v1091_v3  ;;  %v1092_v8 = vadd.f32 %v1088_v7, %v1078_v5  ;;  %2017 = vmatprep.subr.mxu1 %v2689_v6 }
 0x1e4   : > { %2018 = vmatpush3.msra.mxu1 %v1232_v60 }
 0x1e5   : > { %2277 = vpow2.f32 %v1781_v4  ;;  %v1782_v9 = vmul.f32 -1.442695, %v1092_v8  ;;  %2019 = vmatprep.subr.mxu1 %v2689_v6 }
 0x1e6   : > { %2020 = vmatpush3.msra.mxu1 %v1231_v61 }
 0x1e7   : > { %v1073_v10 = vpop.f32.mrf.mxu1  ;;  %2279 = vpow2.f32 %v1782_v9  ;;  %2021 = vmatprep.subr.mxu1 %v2689_v6 }
 0x1e8   : > { %v1120_v17 = vadd.f32 %v1784_v15, %v1073_v10  ;;  %2022 = vmatpush3.msra.mxu1 %v1230_v62 }
 0x1e9   : > { %v1969_v11 = vpop.f32.mrf.mxu1  ;;  %2023 = vmatprep.subr.mxu1 %v2689_v6 }
 0x1ea   : > { %2024 = vmatpush3.msra.mxu1 %v1229_v63  ;;  %v1225_v11 = vld [vmem:[%s3054_s5 + $0x10] sm:$0xff] }
 0x1eb   : > { %2025 = vmatprep.subr.mxu1 %v2689_v6 }
 0x1ec   : > { %2026 = vmatpush3.msra.mxu1 %v1228_v0 }
 0x1ed   : > { %2027 = vmatprep.subr.mxu1 %v2689_v6 }
 0x1ee   : > { %2028 = vmatpush3.msra.mxu1 %v1227_v1 }
 0x1ef   : > { %2029 = vmatprep.subr.mxu1 %v2689_v6 }
 0x1f0   : > { %2030 = vmatpush3.msra.mxu1 %v1226_v2 }
 0x1f1   : > { %2031 = vmatprep.subr.mxu1 %v2689_v6 }
 0x1f2   : > { %v2278_v12 = vpop.eup %2277  ;;  %2032 = vmatpush3.msra.mxu1 %v1225_v11 }
 0x1f3   : > { %v1099_v13 = vadd.f32 1.0, %v2278_v12  ;;  %2033 = vmatprep.subr.mxu1 %v2689_v6  ;;  %v1224_v12 = vld [vmem:[%s3054_s5 + $0x8] sm:$0xff] }
 0x1f4   : > { %v2280_v14 = vpop.eup %2279  ;;  %2034 = vmatpush3.msra.mxu1 %v1224_v12 }
 0x1f5   : > { %2281 = vrcp.f32 %v1099_v13  ;;  %v1100_v16 = vadd.f32 1.0, %v2280_v14  ;;  %2035 = vmatprep.subr.mxu1 %v2689_v6  ;;  %v1223_v13 = vld [vmem:[%s3054_s5] sm:$0xff] }
 0x1f6   : > { %2036 = vmatpush3.msra.mxu1 %v1223_v13 }
 0x1f7   : > { %2283 = vrcp.f32 %v1100_v16 }
 0x202   : > { %v2282_v19 = vpop.eup %2281 }
 0x203   : > { %v1121_v21 = vmul.f32 %v2282_v19, %v1120_v17 }
 0x204   : > { %v2284_v23 = vpop.eup %2283 }
 0x205   : > { %v1122_v22 = vadd.f32 %v1121_v21, %v1112_v20  ;;  %v1124_v24 = vsub.f32 1.0, %v2284_v23  ;;  %v1126_v27 = vmul.f32 %v2284_v23, %v3116_v30  ;;  %v2691_v20 = vmov 1.0  }
 0x207   : > { %2285 = vtanh.f32 %v1122_v22 }
 0x214   : > { %v2286_v25 = vpop.eup %2285 }
 0x215   : > { %v1125_v26 = vmul.f32 %v2286_v25, %v1124_v24 }
 0x217   : > { %v1127_v28 = vadd.f32 %v1126_v27, %v1125_v26 }
 0x219   : > { %1128 = vst [vmem:[#allocation3] sm:$0xff] %v1127_v28  ;;  %2003 = vmatmul.mubr.f32.vlgmr.msra.gmra.mxu0 %v1127_v28 }
 0x2d9   : > { %v1196_v31 = vpop.f32.mrf.mxu0 }
 0x2da   : > { %v1197_v32 = vadd.f32 %v1196_v31, %v1129_v29 }
 0x2db   : > { %v2004_v33 = vpop.f32.mrf.mxu0 }
 0x2dc   : > { %1200 = vmax.xlane.f32.xlu0 %v1197_v32 }
 0x365   : > { %v1201_v35 = vpop.xlane.xlu0 %1200 }
 0x366   : > { %vm1204_vm1 = vcmp.eq.f32.partialorder %v1197_v32, %v1201_v35  ;;  %v1310_v3 = vsub.f32 %v1197_v32, %v1201_v35 }
 0x367   : > { %v1205_v30 = vsel %vm1204_vm1, %v3227_v34, 128 }
 0x368   : > { %v1207_v36 = vshra.s32 %v1205_v30, 16  ;;  %v1311_v4 = vmul.f32 1.442695, %v1310_v3  ;;  %v1206_v5 = vand.u32 65535, %v1205_v30 }
 0x36a   : > { %v1209_v37 = vcvt.s32.f32 %v1207_v36  ;;  %2287 = vpow2.f32 %v1311_v4  ;;  %v1208_v8 = vcvt.s32.f32 %v1206_v5 }
 0x36c   : > { %1210 = vmin.xlane.f32.xlu0 %v1209_v37 }
 0x377   : > { %v2288_v10 = vpop.eup %2287 }
 0x3f5   : > { %v1211_v7 = vpop.xlane.xlu0 %1210 }
 0x3f6   : > { %vm1212_vm2 = vcmp.eq.f32.partialorder %v1209_v37, %v1211_v7  ;;  %v1217_v14 = vcvt.f32.s32 %v1211_v7 }
 0x3f7   : > { %v1213_v9 = vsel %vm1212_vm2, %v1208_v8, inf }
 0x3f8   : > { %1214 = vmin.xlane.f32.xlu1 %v1213_v9  ;;  %v1218_v16 = vshll.u32 %v1217_v14, 16 }
 0x3fc   : > { %1313 = vadd.xlane.f32.xlu1 %v2288_v10 }
 0x481   : > { %v1215_v15 = vpop.xlane.xlu1 %1214 }
 0x482   : > { %v1216_v17 = vcvt.f32.s32 %v1215_v15 }
 0x484   : > { %v1219_v18 = vadd.s32 %v1218_v16, %v1216_v17 }
 0x485   : > { %v1314_v19 = vpop.xlane.xlu1 %1313 }
 0x486   : > { %vm1220_vm3 = vcmp.eq.s32.totalorder %v3227_v34, %v1219_v18  ;;  %2289 = vrcp.f32 %v1314_v19 }
 0x487   : > { %2038 = vmatmul.mubr.msk.f32.vlgmr.msra.gmra.mxu1 %vm1220_vm3, %v2691_v20 }
 0x493   : > { %v2290_v21 = vpop.eup %2289 }
 0x494   : > { %v3262_v22 = vmul.f32 %v2290_v21, %v2288_v10 }
 0x545   : > { %1319 = sbr.rel (%p1780_p12) target bundleno = 1776 (0x6f0), region = 108 }
 0x547   : > { %v1305_v23 = vpop.f32.mrf.mxu1 }
 0x548   : > { %1309 = vst [vmem:[#allocation2] sm:$0xff] %v1305_v23 }
 0x549   : > { %v2039_v24 = vpop.f32.mrf.mxu1 }
 0x54a   : > { %v1405_v6 = vld [vmem:[#allocation16 + $0x78] sm:$0xff]  ;;  %v2692_v25 = vmov 0.0   ;;  %vm2693_vm4 = vmmov 0   ;;  %v1404_v26 = vld [vmem:[#allocation16 + $0x70] sm:$0xff]  ;;  %v1403_v27 = vld [vmem:[#allocation16 + $0x68] sm:$0xff] }
 0x54b   : > { %2040 = vmatprep.subr.mxu0 %v2692_v25  ;;  %2072 = vmatprep.mubr.msk.f32.mxu0 %vm2693_vm4, %v2692_v25  ;;  %v1402_v28 = vld [vmem:[#allocation16 + $0x60] sm:$0xff] }
 0x54c   : > { %2041 = vmatpush3.msra.mxu0 %v3137_v38  ;;  %2075 = vmatprep.subr.mxu1 %v2692_v25  ;;  %v1401_v38 = vld [vmem:[#allocation16 + $0x58] sm:$0xff] }
 0x54d   : > { %2042 = vmatprep.subr.mxu0 %v2692_v25  ;;  %2076 = vmatpush3.msra.mxu1 %v1405_v6 }
 0x54e   : > { %2043 = vmatpush3.msra.mxu0 %v3142_v39  ;;  %2077 = vmatprep.subr.mxu1 %v2692_v25  ;;  %v1400_v39 = vld [vmem:[#allocation16 + $0x50] sm:$0xff] }
 0x54f   : > { %2044 = vmatprep.subr.mxu0 %v2692_v25  ;;  %2078 = vmatpush3.msra.mxu1 %v1404_v26 }
 0x550   : > { %2045 = vmatpush3.msra.mxu0 %v3147_v40  ;;  %2079 = vmatprep.subr.mxu1 %v2692_v25  ;;  %v1399_v40 = vld [vmem:[#allocation16 + $0x48] sm:$0xff] }
 0x551   : > { %2046 = vmatprep.subr.mxu0 %v2692_v25  ;;  %2080 = vmatpush3.msra.mxu1 %v1403_v27 }
 0x552   : > { %2047 = vmatpush3.msra.mxu0 %v3152_v41  ;;  %2081 = vmatprep.subr.mxu1 %v2692_v25  ;;  %v1398_v41 = vld [vmem:[#allocation16 + $0x40] sm:$0xff] }
 0x553   : > { %2048 = vmatprep.subr.mxu0 %v2692_v25  ;;  %2082 = vmatpush3.msra.mxu1 %v1402_v28 }
 0x554   : > { %2049 = vmatpush3.msra.mxu0 %v3157_v42  ;;  %2083 = vmatprep.subr.mxu1 %v2692_v25  ;;  %v1397_v42 = vld [vmem:[#allocation16 + $0x38] sm:$0xff] }
 0x555   : > { %2050 = vmatprep.subr.mxu0 %v2692_v25  ;;  %2084 = vmatpush3.msra.mxu1 %v1401_v38 }
 0x556   : > { %2051 = vmatpush3.msra.mxu0 %v3162_v43  ;;  %2085 = vmatprep.subr.mxu1 %v2692_v25  ;;  %v1396_v43 = vld [vmem:[#allocation16 + $0x30] sm:$0xff] }
 0x557   : > { %2052 = vmatprep.subr.mxu0 %v2692_v25  ;;  %2086 = vmatpush3.msra.mxu1 %v1400_v39 }
 0x558   : > { %2053 = vmatpush3.msra.mxu0 %v3167_v44  ;;  %2087 = vmatprep.subr.mxu1 %v2692_v25  ;;  %v1395_v44 = vld [vmem:[#allocation16 + $0x28] sm:$0xff] }
 0x559   : > { %2054 = vmatprep.subr.mxu0 %v2692_v25  ;;  %2088 = vmatpush3.msra.mxu1 %v1399_v40 }
 0x55a   : > { %2055 = vmatpush3.msra.mxu0 %v3172_v45  ;;  %2089 = vmatprep.subr.mxu1 %v2692_v25  ;;  %v1394_v45 = vld [vmem:[#allocation16 + $0x20] sm:$0xff] }
 0x55b   : > { %2056 = vmatprep.subr.mxu0 %v2692_v25  ;;  %2090 = vmatpush3.msra.mxu1 %v1398_v41 }
 0x55c   : > { %2057 = vmatpush3.msra.mxu0 %v3177_v46  ;;  %2091 = vmatprep.subr.mxu1 %v2692_v25  ;;  %v1393_v46 = vld [vmem:[#allocation16 + $0x18] sm:$0xff] }
 0x55d   : > { %2058 = vmatprep.subr.mxu0 %v2692_v25  ;;  %2092 = vmatpush3.msra.mxu1 %v1397_v42 }
 0x55e   : > { %2059 = vmatpush3.msra.mxu0 %v3182_v47  ;;  %2093 = vmatprep.subr.mxu1 %v2692_v25  ;;  %v1392_v47 = vld [vmem:[#allocation16 + $0x10] sm:$0xff] }
 0x55f   : > { %2060 = vmatprep.subr.mxu0 %v2692_v25  ;;  %2094 = vmatpush3.msra.mxu1 %v1396_v43 }
 0x560   : > { %2061 = vmatpush3.msra.mxu0 %v3187_v48  ;;  %2095 = vmatprep.subr.mxu1 %v2692_v25  ;;  %v1391_v48 = vld [vmem:[#allocation16 + $0x8] sm:$0xff] }
 0x561   : > { %2062 = vmatprep.subr.mxu0 %v2692_v25  ;;  %2096 = vmatpush3.msra.mxu1 %v1395_v44 }
 0x562   : > { %2063 = vmatpush3.msra.mxu0 %v3192_v49  ;;  %2097 = vmatprep.subr.mxu1 %v2692_v25  ;;  %v1390_v49 = vld [vmem:[#allocation16] sm:$0xff] }
 0x563   : > { %2064 = vmatprep.subr.mxu0 %v2692_v25  ;;  %2098 = vmatpush3.msra.mxu1 %v1394_v45 }
 0x564   : > { %2065 = vmatpush3.msra.mxu0 %v3197_v50  ;;  %2099 = vmatprep.subr.mxu1 %v2692_v25 }
 0x565   : > { %2066 = vmatprep.subr.mxu0 %v2692_v25  ;;  %2100 = vmatpush3.msra.mxu1 %v1393_v46 }
 0x566   : > { %2067 = vmatpush3.msra.mxu0 %v3202_v51  ;;  %2101 = vmatprep.subr.mxu1 %v2692_v25 }
 0x567   : > { %2068 = vmatprep.subr.mxu0 %v2692_v25  ;;  %2102 = vmatpush3.msra.mxu1 %v1392_v47 }
 0x568   : > { %2069 = vmatpush3.msra.mxu0 %v3207_v52  ;;  %2103 = vmatprep.subr.mxu1 %v2692_v25  ;;  %v1788_v52 = vld [vmem:[%s3525_s20] ss:$0 sm:$0xff] }
 0x569   : > { %2070 = vmatprep.subr.mxu0 %v2692_v25  ;;  %2104 = vmatpush3.msra.mxu1 %v1391_v48 }
 0x56a   : > { %2071 = vmatpush3.msra.mxu0 %v3212_v53  ;;  %2105 = vmatprep.subr.mxu1 %v2692_v25 }
 0x56b   : > { %2073 = vmatmul.mubr.f32.vlgmr.msra.gmra.mxu0 %v3262_v22  ;;  %2107 = vmatprep.mubr.msk.f32.mxu1 %vm2693_vm4, %v2692_v25 }
 0x56c   : > { %2106 = vmatpush3.msra.mxu1 %v1390_v49 }
 0x62b   : > { %v1386_v50 = vpop.f32.mrf.mxu0 }
 0x62c   : > { %2108 = vmatmul.mubr.f32.vlgmr.msra.gmra.mxu1 %v1386_v50 }
 0x62d   : > { %v2074_v51 = vpop.f32.mrf.mxu0 }
 0x6ec   : > { %v1479_v29 = vpop.f32.mrf.mxu1 }
 0x6ed   : > { %v1480_v31 = vadd.f32 %v1788_v52, %v1479_v29 }
 0x6ee   : > { %v2109_v32 = vpop.f32.mrf.mxu1 }
 0x6ef   : > { %1483 = vst [vmem:[%s665_s16] sm:$0xff] %v1480_v31 }
 0x6f0 PF: > { %s3526_s19 = sld [smem:[#allocation35_spill]]  ;;  %v1484_v53 = vadd.f32 1e-12, %v3262_v22  ;;  %s1505_s13 = sshll.u32 %s665_s16, 4  ;;  %s1506_s13 = int_to_ptr.vmem [resolvable:$true] %s1505_s13 }
 0x6f1   : > { %s3527_s25 = sld [smem:[#allocation39_spill]]  ;;  %s1487_s26 = scalar_lea.sflag [#allocation6], %s3043_s23 }
 0x6f2   : > { %s3528_s24 = sld [smem:[#allocation53_spill]]  ;;  %1485 = vst [vmem:[%s672_s8] sm:$0xff] %v1484_v53  ;;  %s2509_s9 = scalar_lea.vmem %s1506_s13, 128 }
 0x6f3   : > { %p2510_p3 = scmp.ne.s32.totalorder %s1506_s13, %s2509_s9  ;;  %s2694_s27 = smov [#allocation18]  }
 0x6f4   : > { %s2513_s28 = sshll.u32 %s2694_s27, 4  ;;  %s2514_s28 = int_to_ptr.vmem [resolvable:$false] %s2513_s28 }
 0x6f5   : > { %s2515_s15 = scalar_lea.vmem %s2514_s28, 256  ;;  %p2516_p6 = scmp.lt.s32.totalorder %s1506_s13, %s2514_s28 }
 0x6f6   : > { %s1791_s21 = sshll.u32 %s3526_s19, 7  ;;  %p2517_p7 = scmp.lt.s32.totalorder %s2515_s15, %s2509_s9 }
 0x6f7   : > { %p3529_p8 = scmp.ne.s32.totalorder %s3527_s25, 0 }
 0x6f8   : > { %s3329_s11 = scalar_lea.hbm %s3528_s24, %s1791_s21  ;;  %p2518_p10 = por %p2517_p7, %p2516_p6 }
 0x6f9   : > { %p2511_p9 = pnand %p2510_p3, %p3529_p8 }
 0x6fb   : > { %p2512_p1 = pneg %p2511_p9 }
 0x6fd   : > { %p2519_p11 = pnand %p2518_p10, %p2512_p1 }
 0x6ff   : > { %2522 = shalt.err (!%p2519_p11)
}
 0x700   : > { %s2523_s22 = scalar_lea.hbm %s3329_s11, 128  ;;  %s2527_s12 = scalar_lea.hbm %s3528_s24, 256 }
 0x701   : > { %p2524_p5 = scmp.ne.s32.totalorder %s3329_s11, %s2523_s22  ;;  %p2528_p13 = scmp.lt.s32.totalorder %s3329_s11, %s3528_s24 }
 0x702   : > { %p2529_p4 = scmp.lt.s32.totalorder %s2527_s12, %s2523_s22 }
 0x703   : > { %p2525_p0 = pnand %p2524_p5, %p3529_p8 }
 0x704   : > { %p2530_p12 = por %p2529_p4, %p2528_p13 }
 0x705   : > { %p2526_p2 = pneg %p2525_p0 }
 0x707   : > { %p2531_p3 = pnand %p2530_p12, %p2526_p2 }
 0x709   : > { %2534 = shalt.err (!%p2531_p3)
}
 0x70a   : > { %s3530_s20 = sld [smem:[#allocation34_spill]]  ;;  %s1792_s29 = sshll.u32 %s3526_s19, 2 }
 0x70b   : > { %s3532_s7 = sld [smem:[#allocation41_spill]]  ;;  %s1520_s9 = sshll.u32 %s672_s8, 4  ;;  %s1521_s9 = int_to_ptr.vmem [resolvable:$true] %s1520_s9 }
 0x70c   : > { %2132 = dma.vmem_to_hbm [thread:$0]  (%p3529_p8), %s1506_s13, 128, %s3329_s11, %s1487_s26  }
 0x70d   : > { %s3533_s23 = sld [smem:[#allocation54_spill]]  ;;  %s1492_s12 = scalar_lea.sflag [#allocation20], %s670_s14 }
 0x70e   : > { %s2535_s25 = scalar_lea.vmem %s1521_s9, 128  ;;  %s2695_s5 = smov [#allocation19]  }
 0x70f   : > { %p2536_p9 = scmp.ne.s32.totalorder %s1521_s9, %s2535_s25  ;;  %s2539_s30 = sshll.u32 %s2695_s5, 4  ;;  %s2540_s30 = int_to_ptr.vmem [resolvable:$false] %s2539_s30 }
 0x710   : > { %s1516_s27 = sadd.s32 %s3530_s20, %s1792_s29  ;;  %s2541_s19 = scalar_lea.vmem %s2540_s30, 256 }
 0x711   : > { %s1793_s28 = sshll.u32 %s1516_s27, 7  ;;  %p3534_p1 = scmp.ne.s32.totalorder %s3532_s7, 0 }
 0x712   : > { %p2542_p8 = scmp.lt.s32.totalorder %s1521_s9, %s2540_s30  ;;  %p2543_p10 = scmp.lt.s32.totalorder %s2541_s19, %s2535_s25 }
 0x713   : > { %s1518_s16 = scalar_lea.hbm %s3533_s23, %s1793_s28  ;;  %p2537_p6 = pnand %p2536_p9, %p3534_p1 }
 0x714   : > { %p2544_p11 = por %p2543_p10, %p2542_p8 }
 0x715   : > { %p2538_p7 = pneg %p2537_p6 }
 0x717   : > { %p2545_p5 = pnand %p2544_p11, %p2538_p7 }
 0x719   : > { %2548 = shalt.err (!%p2545_p5)
}
 0x71a   : > { %s2549_s1 = scalar_lea.hbm %s1518_s16, 128  ;;  %s2553_s11 = scalar_lea.hbm %s3533_s23, 1024 }
 0x71b   : > { %p2550_p0 = scmp.ne.s32.totalorder %s1518_s16, %s2549_s1  ;;  %p2554_p4 = scmp.lt.s32.totalorder %s1518_s16, %s3533_s23 }
 0x71c   : > { %p2555_p12 = scmp.lt.s32.totalorder %s2553_s11, %s2549_s1 }
 0x71d   : > { %p2551_p2 = pnand %p2550_p0, %p3534_p1 }
 0x71e   : > { %p2556_p3 = por %p2555_p12, %p2554_p4 }
 0x71f   : > { %p2552_p13 = pneg %p2551_p2 }
 0x721   : > { %p2557_p9 = pnand %p2556_p3, %p2552_p13 }
 0x723   : > { %2560 = shalt.err (!%p2557_p9)
}
 0x724   : > { %2133 = dma.vmem_to_hbm [thread:$0]  (%p3534_p1), %s1521_s9, 128, %s1518_s16, %s1492_s12  }
 0x725 PF: > { %s3535_s20 = sld [smem:[#allocation31_spill]]  ;;  %p2176_p6 = scmp.ge.s32.totalorder %s2675_s18, 2 }
 0x726   : > { %s3536_s21 = sld [smem:[#allocation40_spill]] }
 0x72b   : > { %s1532_s29 = sand.u32 1, %s3535_s20  }
 0x72c   : > { %p3537_p7 = scmp.ne.s32.totalorder %s3536_s21, 0  ;;  %s1533_s27 = scalar_lea.sflag [#allocation6], %s1532_s29 }
 0x72e   : > { %p2163_p8 = pnand %p2176_p6, %p3537_p7 }
 0x730   : > { %p2164_p10 = pneg %p2163_p8 }
 0x732   : > { %2626 = dma.done.wait (%p2164_p10), %s1533_s27, 128  }
 0x733   : > { %2628 = vsyncadd (%p2164_p10), %s1533_s27, 4294967168  ;;  %s3538_s28 = sld [smem:[#allocation28_spill]] }
 0x734   : > { %s3539_s15 = sld [smem:[#allocation42_spill]] }
 0x739   : > { %s1541_s22 = sand.u32 1, %s3538_s28  }
 0x73a   : > { %p3540_p11 = scmp.ne.s32.totalorder %s3539_s15, 0  ;;  %s1542_s7 = scalar_lea.sflag [#allocation20], %s1541_s22 }
 0x73c   : > { %p2166_p5 = pnand %p2176_p6, %p3540_p11 }
 0x73e   : > { %p2167_p0 = pneg %p2166_p5 }
 0x740   : > { %2630 = dma.done.wait (%p2167_p0), %s1542_s7, 128  }
 0x741   : > { %2632 = vsyncadd (%p2167_p0), %s1542_s7, 4294967168  ;;  %s41_s18 = sadd.s32 1, %s2675_s18   ;;  %s3541_s25 = sld [smem:[#allocation29_spill]] }
 0x742   : > { %p38_p1 = scmp.ge.s32.totalorder %s41_s18, 10   ;;  %s3542_s26 = sld [smem:[#allocation30_spill]] }
 0x743   : > { %s3543_s27 = sld [smem:[#allocation46_spill]]  ;;  %s3550_s15 = smov %s2671_s17 }
 0x744   : > { %s3544_s28 = sld [smem:[#allocation32_spill]] }
 0x745   : > { %s3545_s29 = sld [smem:[#allocation33_spill]] }
 0x746   : > { %s3546_s30 = sld [smem:[#allocation45_spill]] }
 0x747   : > { %s3547_s14 = sld [smem:[#allocation36_spill]] }
 0x748   : > { %s3548_s16 = sld [smem:[#allocation43_spill]] }
 0x749   : > { %s3549_s9 = sld [smem:[#allocation44_spill]] }
 0x74b   :  { %40 = sbr.rel (!%p38_p1) target bundleno = 26 (0x1a), region = 198 }
 0x74f   : > { %s3551_s17 = smov %s3549_s9 }
 0x750   :  { %1547 = vsyncpa [#allocation5], 1 }
 0x751   :  { %1549 = vsyncpa [#allocation5 + $0x1], 1 }
 0x752   :  { %1550 = vsyncpa [#allocation8], 1 }
 0x753   :  { %1552 = vsyncpa [#allocation8 + $0x1], 1 }
 0x754   :  { %1553 = vsyncpa [#allocation11], 1 }
 0x755   :  { %1555 = vsyncpa [#allocation11 + $0x1], 1 }
 0x756   :  { %1556 = vsyncpa [#allocation14], 1 }
 0x757   :  { %1557 = vsyncpa [#allocation17], 1 }
 0x758   :  { %1558 = vsyncpa [#allocation6], 1 }
 0x759   :  { %1560 = vsyncpa [#allocation6 + $0x1], 1 }
 0x75a   :  { %1561 = vsyncpa [#allocation20], 1 }
 0x75b   :  { %1563 = vsyncpa [#allocation20 + $0x1], 1 }

</bundles_post_ra>
